<compile_context>
chip_gen: v7x
topology: tpu7x:2x2x1
jax: 0.10.0
libtpu: 0.0.40
codegen_flags: <defaults>
</compile_context>

<pallas_src>
import jax
import jax.numpy as jnp
from jax import lax
from jax.experimental import pallas as pl
from jax.experimental.pallas import tpu as pltpu


def _round_up(x, m):
    return (x + m - 1) // m * m


# --------------------------------------------------------------------------
# pass 1: per-pw deconv matmuls, both ph phases folded per grid step,
#         plus per-pw BN batch-stat accumulation
# --------------------------------------------------------------------------
def _make_deconv_kernel(TH, W, H, n_ht, Cout):
    MR = TH * W                        # output rows per (phase, tile)
    full_rows = (H % TH == 0)          # no H padding -> no stat masking needed
    valid_rows = (H - (n_ht - 1) * TH) * W   # real rows in the last H-tile

    def kernel(x0_ref, x1_ref, wt_ref, y_ref, s1_ref, s2_ref):
        # x0_ref / x1_ref : ((TH+2)*W, Cin)   W-shifted views pw / pw+1
        # wt_ref          : (8, Cin, Cout)    taps, index = 4*ph + 2*dh + dw
        # y_ref           : (2, MR, Cout)     ph = 0, 1 output blocks
        # s1_ref / s2_ref : (1, Cout)         per-pw sum / sum-of-squares
        n = pl.program_id(1)
        t = pl.program_id(2)

        @pl.when((n == 0) & (t == 0))
        def _():
            s1_ref[...] = jnp.zeros_like(s1_ref)
            s2_ref[...] = jnp.zeros_like(s2_ref)

        # Hoisted row windows: win[dw][off] = rows [off*W, off*W + MR) of the
        # view shifted by pw+dw.  Static, sublane-friendly offsets.
        win = []
        for x_ref in (x0_ref, x1_ref):
            win.append([x_ref[pl.ds(off * W, MR), :] for off in range(3)])

        accs = []
        for ph in range(2):            # both H-phases from the same inputs
            acc = None
            for dh in range(2):
                for dw in range(2):
                    d = jnp.dot(win[dw][ph + dh],
                                wt_ref[4 * ph + 2 * dh + dw],
                                preferred_element_type=jnp.float32)
                    acc = d if acc is None else acc + d
            y_ref[ph] = acc.astype(y_ref.dtype)
            accs.append(acc)

        def _accum(a0, a1):
            s1_ref[...] += (jnp.sum(a0, axis=0, keepdims=True)
                            + jnp.sum(a1, axis=0, keepdims=True))
            s2_ref[...] += (jnp.sum(a0 * a0, axis=0, keepdims=True)
                            + jnp.sum(a1 * a1, axis=0, keepdims=True))

        if full_rows:
            _accum(accs[0], accs[1])
        else:
            last = n_ht - 1

            @pl.when(t < last)
            def _():
                _accum(accs[0], accs[1])

            @pl.when(t == last)        # mask rows that came from H padding
            def _():
                idx = lax.broadcasted_iota(jnp.int32, (MR, 1), 0)
                valid = (idx < valid_rows).astype(jnp.float32)
                _accum(accs[0] * valid, accs[1] * valid)

    return kernel


def deconv_forward(x_nchw, weight, gamma, beta, *, eps=1e-5,
                   compute_dtype=jnp.float32):
    """ConvTranspose2d(4, stride=2, padding=1, bias=False) + BN(train) + ReLU."""
    N, Cin, H, W = x_nchw.shape
    Cin_w, Cout, KH, KW = weight.shape
    assert (Cin_w, KH, KW) == (Cin, 4, 4)

    # ---- tiling: ~2 MiB blocks (lane padding included); v7x-safe budget ----
    cin_pad = _round_up(Cin, 128)
    cout_pad = _round_up(Cout, 128)
    in_item = jnp.dtype(compute_dtype).itemsize
    tgt = 2 * 1024 * 1024
    th_in = max(1, tgt // max(1, W * cin_pad * in_item))
    th_out = max(1, tgt // max(1, W * cout_pad * 4 * 2))   # 2 resident phase accs
    TH = max(1, min(H, th_in, th_out))
    n_ht = -(-H // TH)
    H_pad = n_ht * TH

    # ---- glue: NHWC, pad, row-halo'd tiles, 3 W-shifted views --------------
    x = jnp.transpose(x_nchw, (0, 2, 3, 1)).astype(compute_dtype)      # NHWC
    xp = jnp.pad(x, ((0, 0), (1, 1 + H_pad - H), (1, 1), (0, 0)))       # pad

    # TODO(synk): replace this wrapper row gather with in-kernel manual DMA
    # (memory_space=pl.ANY + make_async_copy at element offsets) to remove the
    # extra HBM pass when H is large enough to need many row tiles.
    if n_ht > 1:
        rid = (jnp.arange(n_ht)[:, None] * TH
               + jnp.arange(TH + 2)[None, :]).reshape(-1)
        xg = jnp.take(xp, rid, axis=1)             # (N, n_ht*(TH+2), W+2, Cin)
    else:
        xg = xp

    RWS = (TH + 2) * W
    views = [xg[:, :, ow:ow + W, :].reshape(N, n_ht, RWS, Cin)
             for ow in range(3)]
    XS = jnp.stack(views, axis=0)                  # (3, N, n_ht, RWS, Cin)

    # per-pw stack of the 8 tap weight matrices (index = 4*ph + 2*dh + dw)
    wts = []
    for pw in range(2):
        taps = []
        for ph in range(2):
            for dh in range(2):
                for dw in range(2):
                    taps.append(weight[:, :, 3 - ph - 2 * dh, 3 - pw - 2 * dw])
        wts.append(jnp.stack(taps, axis=0))        # (8, Cin, Cout)
    WT = jnp.stack(wts, axis=0).astype(compute_dtype)   # (2, 8, Cin, Cout)

    MR = TH * W
    kernel = _make_deconv_kernel(TH, W, H, n_ht, Cout)

    y, s1, s2 = pl.pallas_call(
        kernel,
        out_shape=(
            jax.ShapeDtypeStruct((2, 2, N, n_ht, MR, Cout), jnp.float32),
            jax.ShapeDtypeStruct((2, 1, Cout), jnp.float32),
            jax.ShapeDtypeStruct((2, 1, Cout), jnp.float32),
        ),
        grid_spec=pltpu.PrefetchScalarGridSpec(
            num_scalar_prefetch=0,
            grid=(2, N, n_ht),                     # (pw, batch, H-tile)
            in_specs=[
                pl.BlockSpec((None, None, None, RWS, Cin),
                             lambda p, n, t: (p, n, t, 0, 0)),
                pl.BlockSpec((None, None, None, RWS, Cin),
                             lambda p, n, t: (p + 1, n, t, 0, 0)),
                pl.BlockSpec((None, 8, Cin, Cout),
                             lambda p, n, t: (p, 0, 0, 0)),
            ],
            out_specs=(
                pl.BlockSpec((None, 2, None, None, MR, Cout),
                             lambda p, n, t: (p, 0, n, t, 0, 0)),
                pl.BlockSpec((None, 1, Cout), lambda p, n, t: (p, 0, 0)),
                pl.BlockSpec((None, 1, Cout), lambda p, n, t: (p, 0, 0)),
            ),
        ),
        compiler_params=pltpu.CompilerParams(
            dimension_semantics=("parallel", "arbitrary", "arbitrary"),
            vmem_limit_bytes=32 * 1024 * 1024),
    )(XS, XS, WT)

    # ---- BN scalars from training-mode batch statistics --------------------
    count = jnp.float32(4 * N * H * W)             # N * (2H) * (2W)
    mean = jnp.sum(s1, axis=(0, 1)) / count        # (Cout,)
    var = jnp.sum(s2, axis=(0, 1)) / count - mean * mean   # biased variance
    scale = gamma.astype(jnp.float32) * lax.rsqrt(var + eps)
    shift = beta.astype(jnp.float32) - mean * scale

    # ---- fused epilogue: BN affine + ReLU folded into the final transpose --
    y6 = y.reshape(2, 2, N, n_ht * TH, W, Cout)[:, :, :, :H]   # (pw,ph,N,H,W,C)
    y6 = jnp.maximum(y6 * scale + shift, 0.0)
    out = jnp.transpose(y6, (2, 5, 3, 1, 4, 0))    # (N, Cout, H, ph, W, pw)
    return out.reshape(N, Cout, 2 * H, 2 * W)


def deconv_reference(x_nchw, weight, gamma, beta, eps=1e-5):
    """Pure-JAX reference: ConvTranspose2d == conv with lhs dilation + flipped,
    channel-swapped kernel; BN with batch statistics; ReLU."""
    w_conv = jnp.transpose(weight[:, :, ::-1, ::-1], (1, 0, 2, 3))      # OIHW
    y = lax.conv_general_dilated(
        x_nchw.astype(jnp.float32), w_conv.astype(jnp.float32),
        window_strides=(1, 1), padding=[(2, 2), (2, 2)],
        lhs_dilation=(2, 2), dimension_numbers=("NCHW", "OIHW", "NCHW"))
    mean = jnp.mean(y, axis=(0, 2, 3), keepdims=True)
    var = jnp.mean((y - mean) ** 2, axis=(0, 2, 3), keepdims=True)
    yn = (y - mean) * lax.rsqrt(var + eps)
    yn = yn * gamma.reshape(1, -1, 1, 1) + beta.reshape(1, -1, 1, 1)
    return jnp.maximum(yn, 0.0)


if __name__ == "__main__":
    # small shapes consistent with the module
    N, Cin, Cout, H, W = 2, 4, 8, 16, 16

    key = jax.random.PRNGKey(0)
    kx, kw = jax.random.split(key)
    x = jax.random.normal(kx, (N, Cin, H, W), dtype=jnp.float32)

    # deterministic parameter init (ConvTranspose2d weight: [Cin, Cout, 4, 4])
    bound = 1.0 / jnp.sqrt(jnp.float32(Cin * 4 * 4))
    weight = jax.random.uniform(kw, (Cin, Cout, 4, 4), jnp.float32,
                                minval=-bound, maxval=bound)
    gamma = jnp.ones((Cout,), jnp.float32)   # BatchNorm2d default affine init
    beta = jnp.zeros((Cout,), jnp.float32)

    out = deconv_forward(x, weight, gamma, beta)
    out = jax.block_until_ready(out)

    ref = deconv_reference(x, weight, gamma, beta)
    assert out.shape == (N, Cout, 2 * H, 2 * W), out.shape
    assert jnp.allclose(out, ref, atol=1e-3, rtol=1e-3), (
        float(jnp.max(jnp.abs(out - ref))))

    print("KERNEL_OK")
</pallas_src>

<mosaic_0001>
module attributes {stable_mosaic.version = 11 : i64} {
  func.func @kernel(%arg0: i32, %arg1: i32, %arg2: i32, %arg3: memref<1x1x1x288x4xf32, #tpu.memory_space<vmem>>, %arg4: memref<1x1x1x288x4xf32, #tpu.memory_space<vmem>>, %arg5: memref<1x8x4x8xf32, #tpu.memory_space<vmem>>, %arg6: memref<1x2x1x1x256x8xf32, #tpu.memory_space<vmem>>, %arg7: memref<1x1x8xf32, #tpu.memory_space<vmem>>, %arg8: memref<1x1x8xf32, #tpu.memory_space<vmem>>) attributes {dimension_semantics = [#tpu.dimension_semantics<parallel>, #tpu.dimension_semantics<arbitrary>, #tpu.dimension_semantics<arbitrary>], iteration_bounds = array<i64: 2, 2, 1>, scalar_prefetch = 0 : i64, scratch_operands = 0 : i64, tpu.core_type = #tpu.core_type<tc>, window_params = [{transform_indices = @transform_0, window_bounds = array<i64: 1, 1, 1, 288, 4>}, {transform_indices = @transform_1, window_bounds = array<i64: 1, 1, 1, 288, 4>}, {transform_indices = @transform_2, window_bounds = array<i64: 1, 8, 4, 8>}, {transform_indices = @transform_3, window_bounds = array<i64: 1, 2, 1, 1, 256, 8>}, {transform_indices = @transform_4, window_bounds = array<i64: 1, 1, 8>}, {transform_indices = @transform_5, window_bounds = array<i64: 1, 1, 8>}]} {
    %c0_i32 = arith.constant 0 : i32
    %0 = arith.cmpi eq, %arg1, %c0_i32 : i32
    %c0_i32_0 = arith.constant 0 : i32
    %1 = arith.cmpi eq, %arg2, %c0_i32_0 : i32
    %2 = arith.andi %0, %1 : i1
    %3 = arith.extui %2 : i1 to i32
    %c0_i32_1 = arith.constant 0 : i32
    %4 = arith.cmpi ne, %3, %c0_i32_1 : i32
    scf.if %4 {
      %cst_89 = arith.constant 0.000000e+00 : f32
      %77 = vector.broadcast %cst_89 : f32 to vector<1x8xf32>
      %c0_90 = arith.constant 0 : index
      %c0_91 = arith.constant 0 : index
      %c0_92 = arith.constant 0 : index
      %78 = vector.load %arg7[%c0_90, %c0_91, %c0_92] : memref<1x1x8xf32, #tpu.memory_space<vmem>>, vector<1x1x8xf32>
      %79 = vector.shape_cast %78 : vector<1x1x8xf32> to vector<1x8xf32>
      %80 = vector.shape_cast %77 : vector<1x8xf32> to vector<1x1x8xf32>
      tpu.vector_store %arg7[%c0_90, %c0_91, %c0_92], %80 {strides = array<i32>} : memref<1x1x8xf32, #tpu.memory_space<vmem>>, vector<1x1x8xf32>,
      %cst_93 = arith.constant 0.000000e+00 : f32
      %81 = vector.broadcast %cst_93 : f32 to vector<1x8xf32>
      %c0_94 = arith.constant 0 : index
      %c0_95 = arith.constant 0 : index
      %c0_96 = arith.constant 0 : index
      %82 = vector.load %arg8[%c0_94, %c0_95, %c0_96] : memref<1x1x8xf32, #tpu.memory_space<vmem>>, vector<1x1x8xf32>
      %83 = vector.shape_cast %82 : vector<1x1x8xf32> to vector<1x8xf32>
      %84 = vector.shape_cast %81 : vector<1x8xf32> to vector<1x1x8xf32>
      tpu.vector_store %arg8[%c0_94, %c0_95, %c0_96], %84 {strides = array<i32>} : memref<1x1x8xf32, #tpu.memory_space<vmem>>, vector<1x1x8xf32>,
    } else {
    }
    %c0 = arith.constant 0 : index
    %c0_2 = arith.constant 0 : index
    %c0_3 = arith.constant 0 : index
    %c0_4 = arith.constant 0 : index
    %c0_5 = arith.constant 0 : index
    %5 = vector.load %arg3[%c0, %c0_2, %c0_3, %c0_4, %c0_5] : memref<1x1x1x288x4xf32, #tpu.memory_space<vmem>>, vector<1x1x1x256x4xf32>
    %6 = vector.shape_cast %5 : vector<1x1x1x256x4xf32> to vector<256x4xf32>
    %c0_6 = arith.constant 0 : index
    %c0_7 = arith.constant 0 : index
    %c0_8 = arith.constant 0 : index
    %c16 = arith.constant 16 : index
    %c0_9 = arith.constant 0 : index
    %7 = vector.load %arg3[%c0_6, %c0_7, %c0_8, %c16, %c0_9] : memref<1x1x1x288x4xf32, #tpu.memory_space<vmem>>, vector<1x1x1x256x4xf32>
    %8 = vector.shape_cast %7 : vector<1x1x1x256x4xf32> to vector<256x4xf32>
    %c0_10 = arith.constant 0 : index
    %c0_11 = arith.constant 0 : index
    %c0_12 = arith.constant 0 : index
    %c32 = arith.constant 32 : index
    %c0_13 = arith.constant 0 : index
    %9 = vector.load %arg3[%c0_10, %c0_11, %c0_12, %c32, %c0_13] : memref<1x1x1x288x4xf32, #tpu.memory_space<vmem>>, vector<1x1x1x256x4xf32>
    %10 = vector.shape_cast %9 : vector<1x1x1x256x4xf32> to vector<256x4xf32>
    %c0_14 = arith.constant 0 : index
    %c0_15 = arith.constant 0 : index
    %c0_16 = arith.constant 0 : index
    %c0_17 = arith.constant 0 : index
    %c0_18 = arith.constant 0 : index
    %11 = vector.load %arg4[%c0_14, %c0_15, %c0_16, %c0_17, %c0_18] : memref<1x1x1x288x4xf32, #tpu.memory_space<vmem>>, vector<1x1x1x256x4xf32>
    %12 = vector.shape_cast %11 : vector<1x1x1x256x4xf32> to vector<256x4xf32>
    %c0_19 = arith.constant 0 : index
    %c0_20 = arith.constant 0 : index
    %c0_21 = arith.constant 0 : index
    %c16_22 = arith.constant 16 : index
    %c0_23 = arith.constant 0 : index
    %13 = vector.load %arg4[%c0_19, %c0_20, %c0_21, %c16_22, %c0_23] : memref<1x1x1x288x4xf32, #tpu.memory_space<vmem>>, vector<1x1x1x256x4xf32>
    %14 = vector.shape_cast %13 : vector<1x1x1x256x4xf32> to vector<256x4xf32>
    %c0_24 = arith.constant 0 : index
    %c0_25 = arith.constant 0 : index
    %c0_26 = arith.constant 0 : index
    %c32_27 = arith.constant 32 : index
    %c0_28 = arith.constant 0 : index
    %15 = vector.load %arg4[%c0_24, %c0_25, %c0_26, %c32_27, %c0_28] : memref<1x1x1x288x4xf32, #tpu.memory_space<vmem>>, vector<1x1x1x256x4xf32>
    %16 = vector.shape_cast %15 : vector<1x1x1x256x4xf32> to vector<256x4xf32>
    %c0_29 = arith.constant 0 : index
    %c0_30 = arith.constant 0 : index
    %c0_31 = arith.constant 0 : index
    %c0_32 = arith.constant 0 : index
    %17 = vector.load %arg5[%c0_29, %c0_30, %c0_31, %c0_32] : memref<1x8x4x8xf32, #tpu.memory_space<vmem>>, vector<1x1x4x8xf32>
    %18 = vector.shape_cast %17 : vector<1x1x4x8xf32> to vector<4x8xf32>
    %cst = arith.constant dense<0.000000e+00> : vector<256x8xf32>
    %19 = tpu.matmul %6, %18, %cst {dimension_numbers = #tpu.dot_dimension_numbers<[1], [0], [0], [1], [0, 0, 1, 1], [], []>} : vector<256x4xf32>, vector<4x8xf32>, vector<256x8xf32> -> vector<256x8xf32>
    %c0_33 = arith.constant 0 : index
    %c1 = arith.constant 1 : index
    %c0_34 = arith.constant 0 : index
    %c0_35 = arith.constant 0 : index
    %20 = vector.load %arg5[%c0_33, %c1, %c0_34, %c0_35] : memref<1x8x4x8xf32, #tpu.memory_space<vmem>>, vector<1x1x4x8xf32>
    %21 = vector.shape_cast %20 : vector<1x1x4x8xf32> to vector<4x8xf32>
    %cst_36 = arith.constant dense<0.000000e+00> : vector<256x8xf32>
    %22 = tpu.matmul %12, %21, %cst_36 {dimension_numbers = #tpu.dot_dimension_numbers<[1], [0], [0], [1], [0, 0, 1, 1], [], []>} : vector<256x4xf32>, vector<4x8xf32>, vector<256x8xf32> -> vector<256x8xf32>
    %23 = arith.addf %19, %22 : vector<256x8xf32>
    %c0_37 = arith.constant 0 : index
    %c2 = arith.constant 2 : index
    %c0_38 = arith.constant 0 : index
    %c0_39 = arith.constant 0 : index
    %24 = vector.load %arg5[%c0_37, %c2, %c0_38, %c0_39] : memref<1x8x4x8xf32, #tpu.memory_space<vmem>>, vector<1x1x4x8xf32>
    %25 = vector.shape_cast %24 : vector<1x1x4x8xf32> to vector<4x8xf32>
    %cst_40 = arith.constant dense<0.000000e+00> : vector<256x8xf32>
    %26 = tpu.matmul %8, %25, %cst_40 {dimension_numbers = #tpu.dot_dimension_numbers<[1], [0], [0], [1], [0, 0, 1, 1], [], []>} : vector<256x4xf32>, vector<4x8xf32>, vector<256x8xf32> -> vector<256x8xf32>
    %27 = arith.addf %23, %26 : vector<256x8xf32>
    %c0_41 = arith.constant 0 : index
    %c3 = arith.constant 3 : index
    %c0_42 = arith.constant 0 : index
    %c0_43 = arith.constant 0 : index
    %28 = vector.load %arg5[%c0_41, %c3, %c0_42, %c0_43] : memref<1x8x4x8xf32, #tpu.memory_space<vmem>>, vector<1x1x4x8xf32>
    %29 = vector.shape_cast %28 : vector<1x1x4x8xf32> to vector<4x8xf32>
    %cst_44 = arith.constant dense<0.000000e+00> : vector<256x8xf32>
    %30 = tpu.matmul %14, %29, %cst_44 {dimension_numbers = #tpu.dot_dimension_numbers<[1], [0], [0], [1], [0, 0, 1, 1], [], []>} : vector<256x4xf32>, vector<4x8xf32>, vector<256x8xf32> -> vector<256x8xf32>
    %31 = arith.addf %27, %30 : vector<256x8xf32>
    %c0_45 = arith.constant 0 : index
    %c0_46 = arith.constant 0 : index
    %c0_47 = arith.constant 0 : index
    %c0_48 = arith.constant 0 : index
    %c0_49 = arith.constant 0 : index
    %c0_50 = arith.constant 0 : index
    %32 = vector.load %arg6[%c0_45, %c0_46, %c0_47, %c0_48, %c0_49, %c0_50] : memref<1x2x1x1x256x8xf32, #tpu.memory_space<vmem>>, vector<1x1x1x1x256x8xf32>
    %33 = vector.shape_cast %32 : vector<1x1x1x1x256x8xf32> to vector<256x8xf32>
    %34 = vector.shape_cast %31 : vector<256x8xf32> to vector<1x1x1x1x256x8xf32>
    tpu.vector_store %arg6[%c0_45, %c0_46, %c0_47, %c0_48, %c0_49, %c0_50], %34 {strides = array<i32>} : memref<1x2x1x1x256x8xf32, #tpu.memory_space<vmem>>, vector<1x1x1x1x256x8xf32>,
    %c0_51 = arith.constant 0 : index
    %c4 = arith.constant 4 : index
    %c0_52 = arith.constant 0 : index
    %c0_53 = arith.constant 0 : index
    %35 = vector.load %arg5[%c0_51, %c4, %c0_52, %c0_53] : memref<1x8x4x8xf32, #tpu.memory_space<vmem>>, vector<1x1x4x8xf32>
    %36 = vector.shape_cast %35 : vector<1x1x4x8xf32> to vector<4x8xf32>
    %cst_54 = arith.constant dense<0.000000e+00> : vector<256x8xf32>
    %37 = tpu.matmul %8, %36, %cst_54 {dimension_numbers = #tpu.dot_dimension_numbers<[1], [0], [0], [1], [0, 0, 1, 1], [], []>} : vector<256x4xf32>, vector<4x8xf32>, vector<256x8xf32> -> vector<256x8xf32>
    %c0_55 = arith.constant 0 : index
    %c5 = arith.constant 5 : index
    %c0_56 = arith.constant 0 : index
    %c0_57 = arith.constant 0 : index
    %38 = vector.load %arg5[%c0_55, %c5, %c0_56, %c0_57] : memref<1x8x4x8xf32, #tpu.memory_space<vmem>>, vector<1x1x4x8xf32>
    %39 = vector.shape_cast %38 : vector<1x1x4x8xf32> to vector<4x8xf32>
    %cst_58 = arith.constant dense<0.000000e+00> : vector<256x8xf32>
    %40 = tpu.matmul %14, %39, %cst_58 {dimension_numbers = #tpu.dot_dimension_numbers<[1], [0], [0], [1], [0, 0, 1, 1], [], []>} : vector<256x4xf32>, vector<4x8xf32>, vector<256x8xf32> -> vector<256x8xf32>
    %41 = arith.addf %37, %40 : vector<256x8xf32>
    %c0_59 = arith.constant 0 : index
    %c6 = arith.constant 6 : index
    %c0_60 = arith.constant 0 : index
    %c0_61 = arith.constant 0 : index
    %42 = vector.load %arg5[%c0_59, %c6, %c0_60, %c0_61] : memref<1x8x4x8xf32, #tpu.memory_space<vmem>>, vector<1x1x4x8xf32>
    %43 = vector.shape_cast %42 : vector<1x1x4x8xf32> to vector<4x8xf32>
    %cst_62 = arith.constant dense<0.000000e+00> : vector<256x8xf32>
    %44 = tpu.matmul %10, %43, %cst_62 {dimension_numbers = #tpu.dot_dimension_numbers<[1], [0], [0], [1], [0, 0, 1, 1], [], []>} : vector<256x4xf32>, vector<4x8xf32>, vector<256x8xf32> -> vector<256x8xf32>
    %45 = arith.addf %41, %44 : vector<256x8xf32>
    %c0_63 = arith.constant 0 : index
    %c7 = arith.constant 7 : index
    %c0_64 = arith.constant 0 : index
    %c0_65 = arith.constant 0 : index
    %46 = vector.load %arg5[%c0_63, %c7, %c0_64, %c0_65] : memref<1x8x4x8xf32, #tpu.memory_space<vmem>>, vector<1x1x4x8xf32>
    %47 = vector.shape_cast %46 : vector<1x1x4x8xf32> to vector<4x8xf32>
    %cst_66 = arith.constant dense<0.000000e+00> : vector<256x8xf32>
    %48 = tpu.matmul %16, %47, %cst_66 {dimension_numbers = #tpu.dot_dimension_numbers<[1], [0], [0], [1], [0, 0, 1, 1], [], []>} : vector<256x4xf32>, vector<4x8xf32>, vector<256x8xf32> -> vector<256x8xf32>
    %49 = arith.addf %45, %48 : vector<256x8xf32>
    %c0_67 = arith.constant 0 : index
    %c1_68 = arith.constant 1 : index
    %c0_69 = arith.constant 0 : index
    %c0_70 = arith.constant 0 : index
    %c0_71 = arith.constant 0 : index
    %c0_72 = arith.constant 0 : index
    %50 = vector.load %arg6[%c0_67, %c1_68, %c0_69, %c0_70, %c0_71, %c0_72] : memref<1x2x1x1x256x8xf32, #tpu.memory_space<vmem>>, vector<1x1x1x1x256x8xf32>
    %51 = vector.shape_cast %50 : vector<1x1x1x1x256x8xf32> to vector<256x8xf32>
    %52 = vector.shape_cast %49 : vector<256x8xf32> to vector<1x1x1x1x256x8xf32>
    tpu.vector_store %arg6[%c0_67, %c1_68, %c0_69, %c0_70, %c0_71, %c0_72], %52 {strides = array<i32>} : memref<1x2x1x1x256x8xf32, #tpu.memory_space<vmem>>, vector<1x1x1x1x256x8xf32>,
    %c0_73 = arith.constant 0 : index
    %c0_74 = arith.constant 0 : index
    %c0_75 = arith.constant 0 : index
    %53 = vector.load %arg7[%c0_73, %c0_74, %c0_75] : memref<1x1x8xf32, #tpu.memory_space<vmem>>, vector<1x1x8xf32>
    %54 = vector.shape_cast %53 : vector<1x1x8xf32> to vector<1x8xf32>
    %cst_76 = arith.constant dense<0.000000e+00> : vector<8xf32>
    %55 = vector.multi_reduction <add>, %31, %cst_76 [0] : vector<256x8xf32> to vector<8xf32>
    %56 = vector.shape_cast %55 : vector<8xf32> to vector<1x8xf32>
    %cst_77 = arith.constant dense<0.000000e+00> : vector<8xf32>
    %57 = vector.multi_reduction <add>, %49, %cst_77 [0] : vector<256x8xf32> to vector<8xf32>
    %58 = vector.shape_cast %57 : vector<8xf32> to vector<1x8xf32>
    %59 = arith.addf %56, %58 : vector<1x8xf32>
    %60 = arith.addf %54, %59 : vector<1x8xf32>
    %c0_78 = arith.constant 0 : index
    %c0_79 = arith.constant 0 : index
    %c0_80 = arith.constant 0 : index
    %61 = vector.load %arg7[%c0_78, %c0_79, %c0_80] : memref<1x1x8xf32, #tpu.memory_space<vmem>>, vector<1x1x8xf32>
    %62 = vector.shape_cast %61 : vector<1x1x8xf32> to vector<1x8xf32>
    %63 = vector.shape_cast %60 : vector<1x8xf32> to vector<1x1x8xf32>
    tpu.vector_store %arg7[%c0_78, %c0_79, %c0_80], %63 {strides = array<i32>} : memref<1x1x8xf32, #tpu.memory_space<vmem>>, vector<1x1x8xf32>,
    %c0_81 = arith.constant 0 : index
    %c0_82 = arith.constant 0 : index
    %c0_83 = arith.constant 0 : index
    %64 = vector.load %arg8[%c0_81, %c0_82, %c0_83] : memref<1x1x8xf32, #tpu.memory_space<vmem>>, vector<1x1x8xf32>
    %65 = vector.shape_cast %64 : vector<1x1x8xf32> to vector<1x8xf32>
    %66 = arith.mulf %31, %31 : vector<256x8xf32>
    %cst_84 = arith.constant dense<0.000000e+00> : vector<8xf32>
    %67 = vector.multi_reduction <add>, %66, %cst_84 [0] : vector<256x8xf32> to vector<8xf32>
    %68 = vector.shape_cast %67 : vector<8xf32> to vector<1x8xf32>
    %69 = arith.mulf %49, %49 : vector<256x8xf32>
    %cst_85 = arith.constant dense<0.000000e+00> : vector<8xf32>
    %70 = vector.multi_reduction <add>, %69, %cst_85 [0] : vector<256x8xf32> to vector<8xf32>
    %71 = vector.shape_cast %70 : vector<8xf32> to vector<1x8xf32>
    %72 = arith.addf %68, %71 : vector<1x8xf32>
    %73 = arith.addf %65, %72 : vector<1x8xf32>
    %c0_86 = arith.constant 0 : index
    %c0_87 = arith.constant 0 : index
    %c0_88 = arith.constant 0 : index
    %74 = vector.load %arg8[%c0_86, %c0_87, %c0_88] : memref<1x1x8xf32, #tpu.memory_space<vmem>>, vector<1x1x8xf32>
    %75 = vector.shape_cast %74 : vector<1x1x8xf32> to vector<1x8xf32>
    %76 = vector.shape_cast %73 : vector<1x8xf32> to vector<1x1x8xf32>
    tpu.vector_store %arg8[%c0_86, %c0_87, %c0_88], %76 {strides = array<i32>} : memref<1x1x8xf32, #tpu.memory_space<vmem>>, vector<1x1x8xf32>,
    return
  }
  func.func @transform_0(%arg0: i32, %arg1: i32, %arg2: i32) -> (i32, i32, i32, i32, i32) {
    %c0_i32 = arith.constant 0 : i32
    %c0_i32_0 = arith.constant 0 : i32
    %c0_i32_1 = arith.constant 0 : i32
    return %arg0, %arg1, %arg2, %c0_i32, %c0_i32_0 : i32, i32, i32, i32, i32
  }
  func.func @transform_1(%arg0: i32, %arg1: i32, %arg2: i32) -> (i32, i32, i32, i32, i32) {
    %c1_i32 = arith.constant 1 : i32
    %0 = arith.addi %arg0, %c1_i32 : i32
    %c0_i32 = arith.constant 0 : i32
    %c0_i32_0 = arith.constant 0 : i32
    %c0_i32_1 = arith.constant 0 : i32
    return %0, %arg1, %arg2, %c0_i32, %c0_i32_0 : i32, i32, i32, i32, i32
  }
  func.func @transform_2(%arg0: i32, %arg1: i32, %arg2: i32) -> (i32, i32, i32, i32) {
    %c0_i32 = arith.constant 0 : i32
    %c0_i32_0 = arith.constant 0 : i32
    %c0_i32_1 = arith.constant 0 : i32
    %c0_i32_2 = arith.constant 0 : i32
    return %arg0, %c0_i32, %c0_i32_0, %c0_i32_1 : i32, i32, i32, i32
  }
  func.func @transform_3(%arg0: i32, %arg1: i32, %arg2: i32) -> (i32, i32, i32, i32, i32, i32) {
    %c0_i32 = arith.constant 0 : i32
    %c0_i32_0 = arith.constant 0 : i32
    %c0_i32_1 = arith.constant 0 : i32
    %c0_i32_2 = arith.constant 0 : i32
    return %arg0, %c0_i32, %arg1, %arg2, %c0_i32_0, %c0_i32_1 : i32, i32, i32, i32, i32, i32
  }
  func.func @transform_4(%arg0: i32, %arg1: i32, %arg2: i32) -> (i32, i32, i32) {
    %c0_i32 = arith.constant 0 : i32
    %c0_i32_0 = arith.constant 0 : i32
    %c0_i32_1 = arith.constant 0 : i32
    return %arg0, %c0_i32, %c0_i32_0 : i32, i32, i32
  }
  func.func @transform_5(%arg0: i32, %arg1: i32, %arg2: i32) -> (i32, i32, i32) {
    %c0_i32 = arith.constant 0 : i32
    %c0_i32_0 = arith.constant 0 : i32
    %c0_i32_1 = arith.constant 0 : i32
    return %arg0, %c0_i32, %c0_i32_0 : i32, i32, i32
  }
}

</mosaic_0001>

<bundles_post_ra>
// kernel: tpu_custom_call.1
= control target key start
LH: loop header
LB: loop body
LE: loop exit
PB: predicated region body
PF: predicated region fallthrough
CT: control target
= control target key end

     0   :  { %11 = vsyncpa [#allocation4], 0  ;;  %s6515_s0 = inlined_call_operand.vmem [shape: f32[3,2,1,288,4], index: 0, kind: input, shape index: {}]   ;;  %s6516_s1 = inlined_call_operand.vmem [shape: f32[3,2,1,288,4], index: 1, kind: input, shape index: {}]   ;;  %s6517_s2 = inlined_call_operand.vmem [shape: f32[2,8,4,8], index: 2, kind: input, shape index: {}]   ;;  %s6518_s3 = inlined_call_operand.vmem [shape: f32[2,2,2,1,256,8], index: 3, kind: output, shape index: {0}]   ;;  %s6519_s4 = inlined_call_operand.hbm [shape: f32[2,1,8], index: 4, kind: output, shape index: {1}]   ;;  %s6520_s5 = inlined_call_operand.hbm [shape: f32[2,1,8], index: 5, kind: output, shape index: {2}]  }
   0x1   :  { %13 = vsyncpa [#allocation4 + $0x1], 0 }
   0x2   :  { %14 = vsyncpa [#allocation6], 0 }
   0x3   :  { %16 = vsyncpa [#allocation6 + $0x1], 0  ;;  %s5010_s18 = smov 0   ;;  %s5012_s19 = smov 0  }
   0x4   :  { %s5014_s20 = smov 0   ;;  %s5016_s21 = smov 0  }
   0x5   :  { %s5018_s22 = smov 0   ;;  %s5020_s23 = smov 0  }
   0x6   :  { %s5022_s24 = smov 0   ;;  %s5024_s25 = smov 0  }
   0x7   :  { %s5026_s26 = smov 0   ;;  %s5028_s27 = smov 0  }
   0x8 LB: > { %6534 = sst [smem:[#allocation9_spill]] %s4939_s18  ;;  %s3557_s28 = sadd.s32 4294967295, %s4975_s27   ;;  %s4975_s27 = sphi %s5028_s27, %s22_s27   ;;  %s4971_s26 = sphi %s5026_s26, %s6562_s26   ;;  %s4967_s25 = sphi %s5024_s25, %s6561_s25   ;;  %s4963_s24 = sphi %s5022_s24, %s6560_s24   ;;  %s4959_s23 = sphi %s5020_s23, %s6559_s23   ;;  %s4955_s22 = sphi %s5018_s22, %s6558_s22   ;;  %s4951_s21 = sphi %s5016_s21, %s6557_s21   ;;  %s4947_s20 = sphi %s5014_s20, %s6556_s20   ;;  %s4943_s19 = sphi %s5012_s19, %s6555_s19   ;;  %s4939_s18 = sphi %s5010_s18, %s6554_s18  }
   0x9   : > { %6535 = sst [smem:[#allocation10_spill]] %s4943_s19  ;;  %s3558_s29 = sadd.s32 4294967294, %s4975_s27  }
   0xa   : > { %6536 = sst [smem:[#allocation11_spill]] %s4947_s20  ;;  %s37_s30 = sadd.s32 1, %s4967_s25 }
   0xb   : > { %6537 = sst [smem:[#allocation12_spill]] %s4955_s22  ;;  %s41_s6 = sadd.s32 1, %s4971_s26 }
   0xc   : > { %6538 = sst [smem:[#allocation13_spill]] %s4967_s25  ;;  %p39_p0 = scmp.ge.s32.totalorder %s37_s30, 2 }
   0xd   : > { %6539 = sst [smem:[#allocation14_spill]] %s4971_s26  ;;  %s140_s7 = sadd.s32 1, %s4955_s22 }
   0xe   : > { %p150_p1 = scmp.ne.s32.totalorder %s4955_s22, %s4951_s21  ;;  %p151_p2 = scmp.eq.s32.totalorder %s3557_s28, 3 }
   0xf   : > { %s6564_s30 = smov (%p39_p0, %s37_s30), 0  ;;  %s6566_s6 = smov (!%p39_p0, %s41_s6), %s4971_s26 }
  0x10   : > { %6540 = sst [smem:[#allocation15_spill]] %s6564_s30  ;;  %s134_s8 = ssub.s32 %s4967_s25, %s6564_s30 }
  0x11   : > { %p5072_p3 = por %p151_p2, %p150_p1  ;;  %p43_p4 = scmp.ge.s32.totalorder %s6566_s6, 2 }
  0x12   : > { %s166_s10 = sadd.s32 1, %s4947_s20  ;;  %p176_p5 = scmp.ne.s32.totalorder %s4947_s20, %s4943_s19 }
  0x13   : > { %p182_p6 = scmp.ne.s32.totalorder %s4943_s19, %s4939_s18  ;;  %s6568_s6 = smov (%p43_p4, %s6566_s6), 0 }
  0x14   : > { %6542 = sst [smem:[#allocation16_spill]] %s6568_s6  ;;  %p5083_p7 = por %p176_p5, %p151_p2 }
  0x15   : > { %p183_p8 = scmp.eq.s32.totalorder %s3558_s29, 3  ;;  %s133_s12 = ssub.s32 %s4971_s26, %s6568_s6 }
  0x16   : > { %p3561_p9 = scmp.ge.s32.totalorder %s4975_s27, 1  ;;  %s135_s13 = sor.u32 %s134_s8, %s133_s12 }
  0x17   : > { %p164_p10 = scmp.eq.s32.totalorder %s133_s12, 0  ;;  %p138_p11 = scmp.eq.s32.totalorder %s135_s13, 0 }
  0x18   : > { %p5090_p12 = por %p183_p8, %p182_p6  ;;  %p269_p13 = scmp.lt.s32.totalorder %s4975_s27, 5 }
  0x19   : > { %s5095_s15 = scalar_select %p164_p10, %s4947_s20, %s166_s10  }
  0x1a   : > { %s6544_s14 = scalar_select %p5090_p12, 1, 0 }
  0x1b   : > { %6546 = sst [smem:[#allocation18_spill]] %s5095_s15  ;;  %p270_p0 = pnand %p3561_p9, %p269_p13 }
  0x1c   : > { %6545 = sst [smem:[#allocation17_spill]] %s6544_s14 }
  0x1d   : > { %s5098_s16 = scalar_select %p138_p11, %s4955_s22, %s140_s7  }
  0x1e   : > { %273 = sbr.rel (%p270_p0) target bundleno = 621 (0x26d), region = 32 }
  0x1f   : > { %6547 = sst [smem:[#allocation19_spill]] %s5098_s16 }
  0x25   : > { %s316_s17 = sand.u32 1, %s4951_s21   ;;  %s5103_s28 = sand.u32 1, %s4943_s19  }
  0x26   : > { %s3562_s29 = sshll.u32 %s316_s17, 9  ;;  %p331_p1 = scmp.lt.s32.totalorder %s4963_s24, 2 }
  0x27   : > { %p333_p2 = scmp.lt.s32.totalorder %s4959_s23, 1  ;;  %s344_s7 = sadd.s32 1, %s4963_s24 }
  0x28   : > { %s332_s8 = scalar_select %p331_p1, %s4963_s24, 2 }
  0x29   : > { %s334_s10 = scalar_select %p333_p2, %s4959_s23, 1 }
  0x2a   : > { %s4738_s12 = smul.u32 72, %s332_s8  ;;  %p345_p4 = scmp.lt.s32.totalorder %s344_s7, 2 }
  0x2b   : > { %s4737_s13 = smul.u32 36, %s334_s10  ;;  %p364_p5 = scmp.eq.s32.totalorder %s4959_s23, 0 }
  0x2c   : > { %s6570_s7 = smov (!%p345_p4, %s344_s7), 2  ;;  %p359_p6 = scmp.lt.s32.totalorder %s4963_s24, 1  ;;  %vm370_vm0 = vcmask (%p364_p5), 57344   ;;  %v4977_v0 = vmov (%p364_p5), 0.0  }
  0x2d   : > { %s341_s6 = sadd.s32 %s4738_s12, %s4737_s13  ;;  %s4739_s21 = smul.u32 72, %s6570_s7 }
  0x2e   : > { %s3563_s30 = sshll.u32 %s341_s6, 3  ;;  %s5128_s7 = scalar_lea.vmem [#allocation2], %s3562_s29 }
  0x2f   : > { %s5114_s17 = scalar_lea.vmem %s6515_s0, %s3563_s30  ;;  %s355_s16 = sadd.s32 %s4739_s21, %s4737_s13 }
  0x30   : > { %s3564_s22 = sshll.u32 %s355_s16, 3  ;;  %s5131_s25 = scalar_lea.vmem [#allocation3], %s5103_s28 }
  0x31   : > { %s5120_s8 = scalar_lea.vmem %s6516_s1, %s3564_s22  ;;  %s5134_s26 = scalar_lea.vmem [#allocation5], %s5103_s28  ;;  %371 = vst.msk [vmem:[%s5131_s25] sm:$0x1] (%p364_p5), %vm370_vm0, %v4977_v0 }
  0x32   : > { %s360_s10 = scalar_select %p359_p6, %s4963_s24, 1 }
  0x33   : > { %369 = sbr.rel (!%p364_p5) target bundleno = 58 (0x3a), region = 36  ;;  %372 = vst.msk [vmem:[%s5134_s26] sm:$0x1] (%p364_p5), %vm370_vm0, %v4977_v0 }
  0x34   : > { %s3879_s19 = sshll.u32 %s360_s10, 5 }
  0x35   : > { %s5126_s6 = scalar_lea.vmem %s6517_s2, %s3879_s19 }
  0x3a PF: > { %v3568_v1 = vld [vmem:[%s5126_s6 + $0x4] sm:$0xf]  ;;  %vm545_vm1 = vcmask 1043456   ;;  %v3704_v2 = vld [vmem:[%s5126_s6 + $0x14] sm:$0xf]  ;;  %vm448_vm2 = vcmask 31744  }
  0x3b   : > { %v409_v3 = vld [vmem:[%s5120_s8] sm:$0xff]  ;;  %4145 = vmatprep.subr.msk.mxu0 %vm545_vm1, %v3568_v1  ;;  %4345 = vmatprep.subr.msk.mxu1 %vm545_vm1, %v3704_v2  ;;  %v5146_v4 = vld [vmem:[%s5120_s8 + $0x10] sm:$0xff]  ;;  %v410_v5 = vld [vmem:[%s5120_s8 + $0x8] sm:$0xff]  ;;  %vm1634_vm3 = vcmask 64512   ;;  %vm2837_vm4 = vcmask 57344   ;;  %s3050_s18 = scalar_lea.sflag [#allocation4], %s5103_s28 }
  0x3c   : > { %v445_v6 = vld [vmem:[%s5126_s6] sm:$0xf]  ;;  %4146 = vmatpush3.msk.msra.mxu0 %vm545_vm1, %v3568_v1  ;;  %4147 = vmatprep.mubr.msk.f32.mxu0 %vm448_vm2, %v409_v3  ;;  %v5153_v7 = vld [vmem:[%s5120_s8 + $0x18] sm:$0xff]  ;;  %v3703_v8 = vld [vmem:[%s5126_s6 + $0x10] sm:$0xf]  ;;  %s3054_s19 = scalar_lea.sflag [#allocation6], %s5103_s28 }
  0x3d   : > { %4346 = vmatpush3.msk.msra.mxu1 %vm545_vm1, %v3704_v2  ;;  %4347 = vmatprep.mubr.msk.f32.mxu1 %vm448_vm2, %v5146_v4  ;;  %v5162_v9 = vld [vmem:[%s5120_s8 + $0x20] sm:$0xff]  ;;  %v5170_v10 = vld [vmem:[%s5120_s8 + $0x28] sm:$0xff]  ;;  %v5177_v11 = vld [vmem:[%s5120_s8 + $0x30] sm:$0xff]  ;;  %s3872_s20 = sshll.u32 (%p5072_p3), %s4959_s23, 5  ;;  %s3873_s22 = sshll.u32 (%p5072_p3), %s4963_s24, 7 }
  0x3e   : > { %4148 = vmatmul.mubr.msk.f32.vlgmr.msra.gmra.mrb[0].mxu0 %vm448_vm2, %v410_v5  ;;  %4195 = vmatprep.subr.msk.mxu0 %vm545_vm1, %v445_v6  ;;  %v5188_v12 = vld [vmem:[%s5120_s8 + $0x38] sm:$0xff]  ;;  %v5191_v13 = vld [vmem:[%s5120_s8 + $0x40] sm:$0xff]  ;;  %v5200_v14 = vld [vmem:[%s5126_s6 + $0x8] sm:$0xf]  ;;  %s3064_s30 = sadd.s32 (%p5072_p3), %s3873_s22, %s3872_s20 }
  0x3f   : > { %4348 = vmatmul.mubr.msk.f32.vlgmr.msra.gmra.mrb[0].mxu1 %vm448_vm2, %v5153_v7  ;;  %4395 = vmatprep.subr.msk.mxu1 %vm545_vm1, %v3703_v8  ;;  %v5205_v15 = vld [vmem:[%s5120_s8 + $0x48] sm:$0xff]  ;;  %v5210_v16 = vld [vmem:[%s5126_s6 + $0x18] sm:$0xf]  ;;  %v5213_v17 = vld [vmem:[%s5120_s8 + $0x50] sm:$0xff]  ;;  %s3874_s9 = sshll.u32 (%p5072_p3), %s3064_s30, 3 }
  0x40   : > { %4196 = vmatpush3.msk.msra.mxu0 %vm545_vm1, %v445_v6  ;;  %4396 = vmatpush3.msk.msra.mxu1 %vm545_vm1, %v3703_v8  ;;  %v5226_v18 = vld [vmem:[%s5120_s8 + $0x58] sm:$0xff]  ;;  %v5229_v19 = vld [vmem:[%s5120_s8 + $0x60] sm:$0xff]  ;;  %v5240_v20 = vld [vmem:[%s5120_s8 + $0x68] sm:$0xff]  ;;  %s6312_s16 = scalar_lea.vmem (%p5072_p3), %s6518_s3, %s3874_s9 }
  0x41   : > { %4150 = vmatprep.mubr.msk.f32.mxu0 %vm448_vm2, %v5146_v4  ;;  %4350 = vmatprep.mubr.msk.f32.mxu1 %vm448_vm2, %v5162_v9  ;;  %v5243_v21 = vld [vmem:[%s5120_s8 + $0x70] sm:$0xff]  ;;  %v5254_v22 = vld [vmem:[%s5120_s8 + $0x78] sm:$0xff]  ;;  %v5257_v23 = vld [vmem:[%s5120_s8 + $0x80] sm:$0xff] }
  0x42   : > { %4151 = vmatmul.mubr.msk.f32.gmra.mrb[2].mxu0 %vm448_vm2, %v5153_v7  ;;  %4245 = vmatprep.subr.msk.mxu0 %vm545_vm1, %v5200_v14  ;;  %v5268_v24 = vld [vmem:[%s5120_s8 + $0x88] sm:$0xff]  ;;  %v5271_v25 = vld [vmem:[%s5120_s8 + $0x90] sm:$0xff]  ;;  %v5282_v26 = vld [vmem:[%s5120_s8 + $0x98] sm:$0xff] }
  0x43   : > { %4351 = vmatmul.mubr.msk.f32.gmra.mrb[2].mxu1 %vm448_vm2, %v5170_v10  ;;  %4153 = vmatprep.mubr.msk.f32.mxu0 %vm448_vm2, %v5162_v9  ;;  %v5285_v27 = vld [vmem:[%s5120_s8 + $0xa0] sm:$0xff]  ;;  %v5296_v28 = vld [vmem:[%s5120_s8 + $0xa8] sm:$0xff]  ;;  %v5299_v29 = vld [vmem:[%s5120_s8 + $0xb0] sm:$0xff] }
  0x44   : > { %4353 = vmatprep.mubr.msk.f32.mxu1 %vm448_vm2, %v5177_v11  ;;  %4445 = vmatprep.subr.msk.mxu1 %vm545_vm1, %v5210_v16  ;;  %v5310_v30 = vld [vmem:[%s5120_s8 + $0xb8] sm:$0xff]  ;;  %v5313_v31 = vld [vmem:[%s5120_s8 + $0xc0] sm:$0xff]  ;;  %v5324_v32 = vld [vmem:[%s5120_s8 + $0xc8] sm:$0xff] }
  0x45   : > { %v5327_v33 = vld [vmem:[%s5120_s8 + $0xd0] sm:$0xff]  ;;  %v5338_v34 = vld [vmem:[%s5120_s8 + $0xd8] sm:$0xff]  ;;  %v5341_v35 = vld [vmem:[%s5120_s8 + $0xe0] sm:$0xff] }
  0x46   : > { %4154 = vmatmul.mubr.msk.f32.gmra.mrb[4].mxu0 %vm448_vm2, %v5170_v10  ;;  %v5352_v36 = vld [vmem:[%s5120_s8 + $0xe8] sm:$0xff]  ;;  %v5355_v37 = vld [vmem:[%s5120_s8 + $0xf0] sm:$0xff]  ;;  %v5366_v38 = vld [vmem:[%s5120_s8 + $0xf8] sm:$0xff] }
  0x47   : > { %4354 = vmatmul.mubr.msk.f32.gmra.mrb[4].mxu1 %vm448_vm2, %v5188_v12  ;;  %4156 = vmatprep.mubr.msk.f32.mxu0 %vm448_vm2, %v5177_v11  ;;  %v5369_v39 = vld [vmem:[%s5120_s8 + $0x100] sm:$0xff]  ;;  %v5380_v40 = vld [vmem:[%s5120_s8 + $0x108] sm:$0xff]  ;;  %v5384_v42 = vld [vmem:[%s5114_s17 + $0x10] sm:$0xff] }
  0x48   : > { %4356 = vmatprep.mubr.msk.f32.mxu1 %vm448_vm2, %v5191_v13  ;;  %6548 = vst [vmem:[#allocation20_spill] sm:$0xff] %v5369_v39  ;;  %6549 = vst [vmem:[#allocation21_spill] sm:$0xff] %v5380_v40  ;;  %v373_v41 = vld [vmem:[%s5114_s17] sm:$0xff]  ;;  %v374_v43 = vld [vmem:[%s5114_s17 + $0x8] sm:$0xff] }
  0x49   : > { %v5395_v44 = vld [vmem:[%s5114_s17 + $0x18] sm:$0xff]  ;;  %v5399_v45 = vld [vmem:[%s5114_s17 + $0x20] sm:$0xff]  ;;  %v5402_v46 = vld [vmem:[%s5126_s6 + $0xc] sm:$0xf] }
  0x4a   : > { %4157 = vmatmul.mubr.msk.f32.gmra.mrb[6].mxu0 %vm448_vm2, %v5188_v12  ;;  %v5409_v47 = vld [vmem:[%s5126_s6 + $0x1c] sm:$0xf]  ;;  %v5416_v48 = vld [vmem:[%s5114_s17 + $0x28] sm:$0xff]  ;;  %v5421_v49 = vld [vmem:[%s5114_s17 + $0x30] sm:$0xff] }
  0x4b   : > { %4357 = vmatmul.mubr.msk.f32.gmra.mrb[6].mxu1 %vm448_vm2, %v5205_v15  ;;  %4159 = vmatprep.mubr.msk.f32.mxu0 %vm448_vm2, %v5191_v13  ;;  %v5436_v50 = vld [vmem:[%s5114_s17 + $0x38] sm:$0xff]  ;;  %v5439_v51 = vld [vmem:[%s5114_s17 + $0x40] sm:$0xff]  ;;  %v5450_v52 = vld [vmem:[%s5114_s17 + $0x48] sm:$0xff] }
  0x4c   : > { %4359 = vmatprep.mubr.msk.f32.mxu1 %vm448_vm2, %v5213_v17  ;;  %v5453_v53 = vld [vmem:[%s5114_s17 + $0x50] sm:$0xff]  ;;  %v5464_v54 = vld [vmem:[%s5114_s17 + $0x58] sm:$0xff]  ;;  %v5467_v55 = vld [vmem:[%s5114_s17 + $0x60] sm:$0xff] }
  0x4d   : > { %v5478_v56 = vld [vmem:[%s5114_s17 + $0x68] sm:$0xff]  ;;  %v5481_v57 = vld [vmem:[%s5114_s17 + $0x70] sm:$0xff]  ;;  %v5492_v58 = vld [vmem:[%s5114_s17 + $0x78] sm:$0xff] }
  0x4e   : > { %4160 = vmatmul.mubr.msk.f32.gmra.mrb[8].mxu0 %vm448_vm2, %v5205_v15  ;;  %v5495_v59 = vld [vmem:[%s5114_s17 + $0x80] sm:$0xff]  ;;  %v5506_v60 = vld [vmem:[%s5114_s17 + $0x88] sm:$0xff]  ;;  %v5509_v61 = vld [vmem:[%s5114_s17 + $0x90] sm:$0xff] }
  0x4f   : > { %4360 = vmatmul.mubr.msk.f32.gmra.mrb[8].mxu1 %vm448_vm2, %v5226_v18  ;;  %4162 = vmatprep.mubr.msk.f32.mxu0 %vm448_vm2, %v5213_v17  ;;  %v5520_v62 = vld [vmem:[%s5114_s17 + $0x98] sm:$0xff]  ;;  %v5523_v63 = vld [vmem:[%s5114_s17 + $0xa0] sm:$0xff]  ;;  %v5534_v0 = vld [vmem:[%s5114_s17 + $0xa8] sm:$0xff] }
  0x50   : > { %4362 = vmatprep.mubr.msk.f32.mxu1 %vm448_vm2, %v5229_v19  ;;  %v5537_v1 = vld [vmem:[%s5114_s17 + $0xb0] sm:$0xff]  ;;  %v5548_v2 = vld [vmem:[%s5114_s17 + $0xb8] sm:$0xff]  ;;  %v5551_v3 = vld [vmem:[%s5114_s17 + $0xc0] sm:$0xff] }
  0x51   : > { %v5562_v5 = vld [vmem:[%s5114_s17 + $0xc8] sm:$0xff]  ;;  %v5565_v6 = vld [vmem:[%s5114_s17 + $0xd0] sm:$0xff]  ;;  %v5576_v8 = vld [vmem:[%s5114_s17 + $0xd8] sm:$0xff] }
  0x52   : > { %4163 = vmatmul.mubr.msk.f32.gmra.mrb[10].mxu0 %vm448_vm2, %v5226_v18 }
  0x53   : > { %4363 = vmatmul.mubr.msk.f32.gmra.mrb[10].mxu1 %vm448_vm2, %v5240_v20  ;;  %4165 = vmatprep.mubr.msk.f32.mxu0 %vm448_vm2, %v5229_v19 }
  0x54   : > { %4365 = vmatprep.mubr.msk.f32.mxu1 %vm448_vm2, %v5243_v21 }
  0x56   : > { %4166 = vmatmul.mubr.msk.f32.gmra.mrb[12].mxu0 %vm448_vm2, %v5240_v20 }
  0x57   : > { %4366 = vmatmul.mubr.msk.f32.gmra.mrb[12].mxu1 %vm448_vm2, %v5254_v22  ;;  %4168 = vmatprep.mubr.msk.f32.mxu0 %vm448_vm2, %v5243_v21 }
  0x58   : > { %4368 = vmatprep.mubr.msk.f32.mxu1 %vm448_vm2, %v5257_v23 }
  0x5a   : > { %4169 = vmatmul.mubr.msk.f32.gmra.mrb[14].mxu0 %vm448_vm2, %v5254_v22 }
  0x5b   : > { %4369 = vmatmul.mubr.msk.f32.gmra.mrb[14].mxu1 %vm448_vm2, %v5268_v24  ;;  %4171 = vmatprep.mubr.msk.f32.mxu0 %vm448_vm2, %v5257_v23 }
  0x5c   : > { %4371 = vmatprep.mubr.msk.f32.mxu1 %vm448_vm2, %v5271_v25 }
  0x5e   : > { %4172 = vmatmul.mubr.msk.f32.gmra.mrb[16].mxu0 %vm448_vm2, %v5268_v24 }
  0x5f   : > { %4372 = vmatmul.mubr.msk.f32.gmra.mrb[16].mxu1 %vm448_vm2, %v5282_v26  ;;  %4174 = vmatprep.mubr.msk.f32.mxu0 %vm448_vm2, %v5271_v25 }
  0x60   : > { %4374 = vmatprep.mubr.msk.f32.mxu1 %vm448_vm2, %v5285_v27 }
  0x62   : > { %4175 = vmatmul.mubr.msk.f32.gmra.mrb[18].mxu0 %vm448_vm2, %v5282_v26 }
  0x63   : > { %4375 = vmatmul.mubr.msk.f32.gmra.mrb[18].mxu1 %vm448_vm2, %v5296_v28  ;;  %4177 = vmatprep.mubr.msk.f32.mxu0 %vm448_vm2, %v5285_v27 }
  0x64   : > { %4377 = vmatprep.mubr.msk.f32.mxu1 %vm448_vm2, %v5299_v29 }
  0x66   : > { %4178 = vmatmul.mubr.msk.f32.gmra.mrb[20].mxu0 %vm448_vm2, %v5296_v28 }
  0x67   : > { %4378 = vmatmul.mubr.msk.f32.gmra.mrb[20].mxu1 %vm448_vm2, %v5310_v30  ;;  %4180 = vmatprep.mubr.msk.f32.mxu0 %vm448_vm2, %v5299_v29 }
  0x68   : > { %4380 = vmatprep.mubr.msk.f32.mxu1 %vm448_vm2, %v5313_v31 }
  0x6a   : > { %4181 = vmatmul.mubr.msk.f32.gmra.mrb[22].mxu0 %vm448_vm2, %v5310_v30 }
  0x6b   : > { %4381 = vmatmul.mubr.msk.f32.gmra.mrb[22].mxu1 %vm448_vm2, %v5324_v32  ;;  %4183 = vmatprep.mubr.msk.f32.mxu0 %vm448_vm2, %v5313_v31 }
  0x6c   : > { %4383 = vmatprep.mubr.msk.f32.mxu1 %vm448_vm2, %v5327_v33 }
  0x6e   : > { %4184 = vmatmul.mubr.msk.f32.gmra.mrb[24].mxu0 %vm448_vm2, %v5324_v32 }
  0x6f   : > { %4384 = vmatmul.mubr.msk.f32.gmra.mrb[24].mxu1 %vm448_vm2, %v5338_v34  ;;  %4186 = vmatprep.mubr.msk.f32.mxu0 %vm448_vm2, %v5327_v33 }
  0x70   : > { %4386 = vmatprep.mubr.msk.f32.mxu1 %vm448_vm2, %v5341_v35 }
  0x72   : > { %4187 = vmatmul.mubr.msk.f32.gmra.mrb[26].mxu0 %vm448_vm2, %v5338_v34 }
  0x73   : > { %4387 = vmatmul.mubr.msk.f32.gmra.mrb[26].mxu1 %vm448_vm2, %v5352_v36  ;;  %4189 = vmatprep.mubr.msk.f32.mxu0 %vm448_vm2, %v5341_v35 }
  0x74   : > { %4389 = vmatprep.mubr.msk.f32.mxu1 %vm448_vm2, %v5355_v37 }
  0x76   : > { %4190 = vmatmul.mubr.msk.f32.gmra.mrb[28].mxu0 %vm448_vm2, %v5352_v36 }
  0x77   : > { %4390 = vmatmul.mubr.msk.f32.gmra.mrb[28].mxu1 %vm448_vm2, %v5366_v38  ;;  %4192 = vmatprep.mubr.msk.f32.mxu0 %vm448_vm2, %v5355_v37 }
  0x78   : > { %4392 = vmatprep.mubr.msk.f32.mxu1 %vm448_vm2, %v5369_v39  ;;  %v5618_v39 = vld [vmem:[%s5114_s17 + $0x108] sm:$0xff] }
  0x7a   : > { %4193 = vmatmul.mubr.msk.f32.gmra.mrb[30].mxu0 %vm448_vm2, %v5366_v38 }
  0x7b   : > { %4393 = vmatmul.mubr.msk.f32.gmra.mrb[30].mxu1 %vm448_vm2, %v5380_v40  ;;  %4197 = vmatprep.mubr.msk.f32.mxu0 %vm448_vm2, %v373_v41  ;;  %v5593_v41 = vld [vmem:[%s5114_s17 + $0xf0] sm:$0xff]  ;;  %v5607_v40 = vld [vmem:[%s5114_s17 + $0x100] sm:$0xff] }
  0x7c   : > { %4397 = vmatprep.mubr.msk.f32.mxu1 %vm448_vm2, %v5384_v42 }
  0x7e   : > { %4198 = vmatmul.mubr.msk.f32.vlgmr.msra.gmra.mrb[0].mxu0 %vm448_vm2, %v374_v43  ;;  %v5604_v43 = vld [vmem:[%s5114_s17 + $0xf8] sm:$0xff] }
  0x7f   : > { %4398 = vmatmul.mubr.msk.f32.vlgmr.msra.gmra.mrb[0].mxu1 %vm448_vm2, %v5395_v44  ;;  %4246 = vmatpush3.msk.msra.mxu0 %vm545_vm1, %v5200_v14  ;;  %v5579_v14 = vld [vmem:[%s5114_s17 + $0xe0] sm:$0xff] }
  0x80   : > { %4446 = vmatpush3.msk.msra.mxu1 %vm545_vm1, %v5210_v16  ;;  %4200 = vmatprep.mubr.msk.f32.mxu0 %vm448_vm2, %v5384_v42  ;;  %v5590_v16 = vld [vmem:[%s5114_s17 + $0xe8] sm:$0xff] }
  0x81   : > { %4400 = vmatprep.mubr.msk.f32.mxu1 %vm448_vm2, %v5399_v45  ;;  %4295 = vmatprep.subr.msk.mxu0 %vm545_vm1, %v5402_v46 }
  0x82   : > { %4201 = vmatmul.mubr.msk.f32.gmra.mrb[2].mxu0 %vm448_vm2, %v5395_v44  ;;  %4495 = vmatprep.subr.msk.mxu1 %vm545_vm1, %v5409_v47 }
  0x83   : > { %4401 = vmatmul.mubr.msk.f32.gmra.mrb[2].mxu1 %vm448_vm2, %v5416_v48  ;;  %4203 = vmatprep.mubr.msk.f32.mxu0 %vm448_vm2, %v5399_v45 }
  0x84   : > { %4403 = vmatprep.mubr.msk.f32.mxu1 %vm448_vm2, %v5421_v49 }
  0x86   : > { %4204 = vmatmul.mubr.msk.f32.gmra.mrb[4].mxu0 %vm448_vm2, %v5416_v48 }
  0x87   : > { %4404 = vmatmul.mubr.msk.f32.gmra.mrb[4].mxu1 %vm448_vm2, %v5436_v50  ;;  %4206 = vmatprep.mubr.msk.f32.mxu0 %vm448_vm2, %v5421_v49 }
  0x88   : > { %4406 = vmatprep.mubr.msk.f32.mxu1 %vm448_vm2, %v5439_v51 }
  0x8a   : > { %4207 = vmatmul.mubr.msk.f32.gmra.mrb[6].mxu0 %vm448_vm2, %v5436_v50 }
  0x8b   : > { %4407 = vmatmul.mubr.msk.f32.gmra.mrb[6].mxu1 %vm448_vm2, %v5450_v52  ;;  %4209 = vmatprep.mubr.msk.f32.mxu0 %vm448_vm2, %v5439_v51 }
  0x8c   : > { %4409 = vmatprep.mubr.msk.f32.mxu1 %vm448_vm2, %v5453_v53 }
  0x8e   : > { %4210 = vmatmul.mubr.msk.f32.gmra.mrb[8].mxu0 %vm448_vm2, %v5450_v52 }
  0x8f   : > { %4410 = vmatmul.mubr.msk.f32.gmra.mrb[8].mxu1 %vm448_vm2, %v5464_v54  ;;  %4212 = vmatprep.mubr.msk.f32.mxu0 %vm448_vm2, %v5453_v53 }
  0x90   : > { %4412 = vmatprep.mubr.msk.f32.mxu1 %vm448_vm2, %v5467_v55 }
  0x92   : > { %4213 = vmatmul.mubr.msk.f32.gmra.mrb[10].mxu0 %vm448_vm2, %v5464_v54 }
  0x93   : > { %4413 = vmatmul.mubr.msk.f32.gmra.mrb[10].mxu1 %vm448_vm2, %v5478_v56  ;;  %4215 = vmatprep.mubr.msk.f32.mxu0 %vm448_vm2, %v5467_v55 }
  0x94   : > { %4415 = vmatprep.mubr.msk.f32.mxu1 %vm448_vm2, %v5481_v57 }
  0x96   : > { %4216 = vmatmul.mubr.msk.f32.gmra.mrb[12].mxu0 %vm448_vm2, %v5478_v56 }
  0x97   : > { %4416 = vmatmul.mubr.msk.f32.gmra.mrb[12].mxu1 %vm448_vm2, %v5492_v58  ;;  %4218 = vmatprep.mubr.msk.f32.mxu0 %vm448_vm2, %v5481_v57 }
  0x98   : > { %4418 = vmatprep.mubr.msk.f32.mxu1 %vm448_vm2, %v5495_v59 }
  0x9a   : > { %4219 = vmatmul.mubr.msk.f32.gmra.mrb[14].mxu0 %vm448_vm2, %v5492_v58 }
  0x9b   : > { %4419 = vmatmul.mubr.msk.f32.gmra.mrb[14].mxu1 %vm448_vm2, %v5506_v60  ;;  %4221 = vmatprep.mubr.msk.f32.mxu0 %vm448_vm2, %v5495_v59 }
  0x9c   : > { %4421 = vmatprep.mubr.msk.f32.mxu1 %vm448_vm2, %v5509_v61 }
  0x9e   : > { %4222 = vmatmul.mubr.msk.f32.gmra.mrb[16].mxu0 %vm448_vm2, %v5506_v60 }
  0x9f   : > { %4422 = vmatmul.mubr.msk.f32.gmra.mrb[16].mxu1 %vm448_vm2, %v5520_v62  ;;  %4224 = vmatprep.mubr.msk.f32.mxu0 %vm448_vm2, %v5509_v61 }
  0xa0   : > { %4424 = vmatprep.mubr.msk.f32.mxu1 %vm448_vm2, %v5523_v63 }
  0xa2   : > { %4225 = vmatmul.mubr.msk.f32.gmra.mrb[18].mxu0 %vm448_vm2, %v5520_v62 }
  0xa3   : > { %4425 = vmatmul.mubr.msk.f32.gmra.mrb[18].mxu1 %vm448_vm2, %v5534_v0  ;;  %4227 = vmatprep.mubr.msk.f32.mxu0 %vm448_vm2, %v5523_v63 }
  0xa4   : > { %4427 = vmatprep.mubr.msk.f32.mxu1 %vm448_vm2, %v5537_v1 }
  0xa6   : > { %4228 = vmatmul.mubr.msk.f32.gmra.mrb[20].mxu0 %vm448_vm2, %v5534_v0 }
  0xa7   : > { %4428 = vmatmul.mubr.msk.f32.gmra.mrb[20].mxu1 %vm448_vm2, %v5548_v2  ;;  %4230 = vmatprep.mubr.msk.f32.mxu0 %vm448_vm2, %v5537_v1 }
  0xa8   : > { %4430 = vmatprep.mubr.msk.f32.mxu1 %vm448_vm2, %v5551_v3 }
  0xaa   : > { %4231 = vmatmul.mubr.msk.f32.gmra.mrb[22].mxu0 %vm448_vm2, %v5548_v2 }
  0xab   : > { %4431 = vmatmul.mubr.msk.f32.gmra.mrb[22].mxu1 %vm448_vm2, %v5562_v5  ;;  %4233 = vmatprep.mubr.msk.f32.mxu0 %vm448_vm2, %v5551_v3 }
  0xac   : > { %4433 = vmatprep.mubr.msk.f32.mxu1 %vm448_vm2, %v5565_v6 }
  0xae   : > { %4234 = vmatmul.mubr.msk.f32.gmra.mrb[24].mxu0 %vm448_vm2, %v5562_v5 }
  0xaf   : > { %4434 = vmatmul.mubr.msk.f32.gmra.mrb[24].mxu1 %vm448_vm2, %v5576_v8  ;;  %4236 = vmatprep.mubr.msk.f32.mxu0 %vm448_vm2, %v5565_v6 }
  0xb0   : > { %4436 = vmatprep.mubr.msk.f32.mxu1 %vm448_vm2, %v5579_v14 }
  0xb2   : > { %4237 = vmatmul.mubr.msk.f32.gmra.mrb[26].mxu0 %vm448_vm2, %v5576_v8 }
  0xb3   : > { %4437 = vmatmul.mubr.msk.f32.gmra.mrb[26].mxu1 %vm448_vm2, %v5590_v16  ;;  %4239 = vmatprep.mubr.msk.f32.mxu0 %vm448_vm2, %v5579_v14 }
  0xb4   : > { %4439 = vmatprep.mubr.msk.f32.mxu1 %vm448_vm2, %v5593_v41 }
  0xb6   : > { %4240 = vmatmul.mubr.msk.f32.gmra.mrb[28].mxu0 %vm448_vm2, %v5590_v16 }
  0xb7   : > { %4440 = vmatmul.mubr.msk.f32.gmra.mrb[28].mxu1 %vm448_vm2, %v5604_v43  ;;  %4242 = vmatprep.mubr.msk.f32.mxu0 %vm448_vm2, %v5593_v41 }
  0xb8   : > { %4442 = vmatprep.mubr.msk.f32.mxu1 %vm448_vm2, %v5607_v40 }
  0xba   : > { %4243 = vmatmul.mubr.msk.f32.gmra.mrb[30].mxu0 %vm448_vm2, %v5604_v43 }
  0xbb   : > { %4443 = vmatmul.mubr.msk.f32.gmra.mrb[30].mxu1 %vm448_vm2, %v5618_v39  ;;  %4247 = vmatprep.mubr.msk.f32.mxu0 %vm448_vm2, %v5384_v42  ;;  %v407_v42 = vld [vmem:[%s5114_s17 + $0x110] sm:$0xff] }
  0xbc   : > { %4447 = vmatprep.mubr.msk.f32.mxu1 %vm448_vm2, %v5399_v45 }
  0xbe   : > { %4248 = vmatmul.mubr.msk.f32.vlgmr.msra.gmra.mrb[0].mxu0 %vm448_vm2, %v5395_v44  ;;  %v408_v44 = vld [vmem:[%s5114_s17 + $0x118] sm:$0xff] }
  0xbf   : > { %4448 = vmatmul.mubr.msk.f32.vlgmr.msra.gmra.mrb[0].mxu1 %vm448_vm2, %v5416_v48  ;;  %4296 = vmatpush3.msk.msra.mxu0 %vm545_vm1, %v5402_v46 }
  0xc0   : > { %4496 = vmatpush3.msk.msra.mxu1 %vm545_vm1, %v5409_v47  ;;  %4250 = vmatprep.mubr.msk.f32.mxu0 %vm448_vm2, %v5399_v45 }
  0xc1   : > { %4450 = vmatprep.mubr.msk.f32.mxu1 %vm448_vm2, %v5421_v49 }
  0xc2   : > { %4251 = vmatmul.mubr.msk.f32.gmra.mrb[2].mxu0 %vm448_vm2, %v5416_v48 }
  0xc3   : > { %4451 = vmatmul.mubr.msk.f32.gmra.mrb[2].mxu1 %vm448_vm2, %v5436_v50  ;;  %4253 = vmatprep.mubr.msk.f32.mxu0 %vm448_vm2, %v5421_v49 }
  0xc4   : > { %4453 = vmatprep.mubr.msk.f32.mxu1 %vm448_vm2, %v5439_v51 }
  0xc6   : > { %4254 = vmatmul.mubr.msk.f32.gmra.mrb[4].mxu0 %vm448_vm2, %v5436_v50 }
  0xc7   : > { %4454 = vmatmul.mubr.msk.f32.gmra.mrb[4].mxu1 %vm448_vm2, %v5450_v52  ;;  %4256 = vmatprep.mubr.msk.f32.mxu0 %vm448_vm2, %v5439_v51 }
  0xc8   : > { %4456 = vmatprep.mubr.msk.f32.mxu1 %vm448_vm2, %v5453_v53 }
  0xca   : > { %4257 = vmatmul.mubr.msk.f32.gmra.mrb[6].mxu0 %vm448_vm2, %v5450_v52 }
  0xcb   : > { %4457 = vmatmul.mubr.msk.f32.gmra.mrb[6].mxu1 %vm448_vm2, %v5464_v54  ;;  %4259 = vmatprep.mubr.msk.f32.mxu0 %vm448_vm2, %v5453_v53 }
  0xcc   : > { %4459 = vmatprep.mubr.msk.f32.mxu1 %vm448_vm2, %v5467_v55 }
  0xce   : > { %4260 = vmatmul.mubr.msk.f32.gmra.mrb[8].mxu0 %vm448_vm2, %v5464_v54 }
  0xcf   : > { %4460 = vmatmul.mubr.msk.f32.gmra.mrb[8].mxu1 %vm448_vm2, %v5478_v56  ;;  %4262 = vmatprep.mubr.msk.f32.mxu0 %vm448_vm2, %v5467_v55 }
  0xd0   : > { %4462 = vmatprep.mubr.msk.f32.mxu1 %vm448_vm2, %v5481_v57 }
  0xd2   : > { %4263 = vmatmul.mubr.msk.f32.gmra.mrb[10].mxu0 %vm448_vm2, %v5478_v56 }
  0xd3   : > { %4463 = vmatmul.mubr.msk.f32.gmra.mrb[10].mxu1 %vm448_vm2, %v5492_v58  ;;  %4265 = vmatprep.mubr.msk.f32.mxu0 %vm448_vm2, %v5481_v57 }
  0xd4   : > { %4465 = vmatprep.mubr.msk.f32.mxu1 %vm448_vm2, %v5495_v59 }
  0xd6   : > { %4266 = vmatmul.mubr.msk.f32.gmra.mrb[12].mxu0 %vm448_vm2, %v5492_v58 }
  0xd7   : > { %4466 = vmatmul.mubr.msk.f32.gmra.mrb[12].mxu1 %vm448_vm2, %v5506_v60  ;;  %4268 = vmatprep.mubr.msk.f32.mxu0 %vm448_vm2, %v5495_v59 }
  0xd8   : > { %4468 = vmatprep.mubr.msk.f32.mxu1 %vm448_vm2, %v5509_v61 }
  0xda   : > { %4269 = vmatmul.mubr.msk.f32.gmra.mrb[14].mxu0 %vm448_vm2, %v5506_v60 }
  0xdb   : > { %4469 = vmatmul.mubr.msk.f32.gmra.mrb[14].mxu1 %vm448_vm2, %v5520_v62  ;;  %4271 = vmatprep.mubr.msk.f32.mxu0 %vm448_vm2, %v5509_v61 }
  0xdc   : > { %4471 = vmatprep.mubr.msk.f32.mxu1 %vm448_vm2, %v5523_v63 }
  0xde   : > { %4272 = vmatmul.mubr.msk.f32.gmra.mrb[16].mxu0 %vm448_vm2, %v5520_v62 }
  0xdf   : > { %4472 = vmatmul.mubr.msk.f32.gmra.mrb[16].mxu1 %vm448_vm2, %v5534_v0  ;;  %4274 = vmatprep.mubr.msk.f32.mxu0 %vm448_vm2, %v5523_v63 }
  0xe0   : > { %4474 = vmatprep.mubr.msk.f32.mxu1 %vm448_vm2, %v5537_v1 }
  0xe2   : > { %4275 = vmatmul.mubr.msk.f32.gmra.mrb[18].mxu0 %vm448_vm2, %v5534_v0 }
  0xe3   : > { %4475 = vmatmul.mubr.msk.f32.gmra.mrb[18].mxu1 %vm448_vm2, %v5548_v2  ;;  %4277 = vmatprep.mubr.msk.f32.mxu0 %vm448_vm2, %v5537_v1 }
  0xe4   : > { %4477 = vmatprep.mubr.msk.f32.mxu1 %vm448_vm2, %v5551_v3 }
  0xe6   : > { %4278 = vmatmul.mubr.msk.f32.gmra.mrb[20].mxu0 %vm448_vm2, %v5548_v2 }
  0xe7   : > { %4478 = vmatmul.mubr.msk.f32.gmra.mrb[20].mxu1 %vm448_vm2, %v5562_v5  ;;  %4280 = vmatprep.mubr.msk.f32.mxu0 %vm448_vm2, %v5551_v3 }
  0xe8   : > { %4480 = vmatprep.mubr.msk.f32.mxu1 %vm448_vm2, %v5565_v6 }
  0xea   : > { %4281 = vmatmul.mubr.msk.f32.gmra.mrb[22].mxu0 %vm448_vm2, %v5562_v5 }
  0xeb   : > { %4481 = vmatmul.mubr.msk.f32.gmra.mrb[22].mxu1 %vm448_vm2, %v5576_v8  ;;  %4283 = vmatprep.mubr.msk.f32.mxu0 %vm448_vm2, %v5565_v6 }
  0xec   : > { %4483 = vmatprep.mubr.msk.f32.mxu1 %vm448_vm2, %v5579_v14 }
  0xee   : > { %4284 = vmatmul.mubr.msk.f32.gmra.mrb[24].mxu0 %vm448_vm2, %v5576_v8 }
  0xef   : > { %4484 = vmatmul.mubr.msk.f32.gmra.mrb[24].mxu1 %vm448_vm2, %v5590_v16  ;;  %4286 = vmatprep.mubr.msk.f32.mxu0 %vm448_vm2, %v5579_v14 }
  0xf0   : > { %4486 = vmatprep.mubr.msk.f32.mxu1 %vm448_vm2, %v5593_v41 }
  0xf2   : > { %4287 = vmatmul.mubr.msk.f32.gmra.mrb[26].mxu0 %vm448_vm2, %v5590_v16 }
  0xf3   : > { %4487 = vmatmul.mubr.msk.f32.gmra.mrb[26].mxu1 %vm448_vm2, %v5604_v43  ;;  %4289 = vmatprep.mubr.msk.f32.mxu0 %vm448_vm2, %v5593_v41 }
  0xf4   : > { %4489 = vmatprep.mubr.msk.f32.mxu1 %vm448_vm2, %v5607_v40 }
  0xf6   : > { %4290 = vmatmul.mubr.msk.f32.gmra.mrb[28].mxu0 %vm448_vm2, %v5604_v43 }
  0xf7   : > { %4490 = vmatmul.mubr.msk.f32.gmra.mrb[28].mxu1 %vm448_vm2, %v5618_v39  ;;  %4292 = vmatprep.mubr.msk.f32.mxu0 %vm448_vm2, %v5607_v40 }
  0xf8   : > { %4492 = vmatprep.mubr.msk.f32.mxu1 %vm448_vm2, %v407_v42 }
  0xfa   : > { %4293 = vmatmul.mubr.msk.f32.gmra.mrb[30].mxu0 %vm448_vm2, %v5618_v39 }
  0xfb   : > { %4493 = vmatmul.mubr.msk.f32.gmra.mrb[30].mxu1 %vm448_vm2, %v408_v44  ;;  %4297 = vmatprep.mubr.msk.f32.mxu0 %vm448_vm2, %v5146_v4  ;;  %v6550_v4 = vld [vmem:[#allocation20_spill] sm:$0xff] }
  0xfc   : > { %4497 = vmatprep.mubr.msk.f32.mxu1 %vm448_vm2, %v5162_v9 }
  0xfe   : > { %4298 = vmatmul.mubr.msk.f32.vlgmr.msra.gmra.mrb[0].mxu0 %vm448_vm2, %v5153_v7  ;;  %v443_v7 = vld [vmem:[%s5120_s8 + $0x110] sm:$0xff] }
  0xff   : > { %4498 = vmatmul.mubr.msk.f32.vlgmr.msra.gmra.mrb[0].mxu1 %vm448_vm2, %v5170_v10  ;;  %4300 = vmatprep.mubr.msk.f32.mxu0 %vm448_vm2, %v5162_v9  ;;  %v6551_v9 = vld [vmem:[#allocation21_spill] sm:$0xff] }
 0x100   : > { %4500 = vmatprep.mubr.msk.f32.mxu1 %vm448_vm2, %v5177_v11 }
 0x102   : > { %4301 = vmatmul.mubr.msk.f32.gmra.mrb[2].mxu0 %vm448_vm2, %v5170_v10  ;;  %v444_v10 = vld [vmem:[%s5120_s8 + $0x118] sm:$0xff] }
 0x103   : > { %4501 = vmatmul.mubr.msk.f32.gmra.mrb[2].mxu1 %vm448_vm2, %v5188_v12  ;;  %4303 = vmatprep.mubr.msk.f32.mxu0 %vm448_vm2, %v5177_v11 }
 0x104   : > { %4503 = vmatprep.mubr.msk.f32.mxu1 %vm448_vm2, %v5191_v13 }
 0x106   : > { %4304 = vmatmul.mubr.msk.f32.gmra.mrb[4].mxu0 %vm448_vm2, %v5188_v12 }
 0x107   : > { %4504 = vmatmul.mubr.msk.f32.gmra.mrb[4].mxu1 %vm448_vm2, %v5205_v15  ;;  %4306 = vmatprep.mubr.msk.f32.mxu0 %vm448_vm2, %v5191_v13 }
 0x108   : > { %4506 = vmatprep.mubr.msk.f32.mxu1 %vm448_vm2, %v5213_v17 }
 0x10a   : > { %4307 = vmatmul.mubr.msk.f32.gmra.mrb[6].mxu0 %vm448_vm2, %v5205_v15 }
 0x10b   : > { %4507 = vmatmul.mubr.msk.f32.gmra.mrb[6].mxu1 %vm448_vm2, %v5226_v18  ;;  %4309 = vmatprep.mubr.msk.f32.mxu0 %vm448_vm2, %v5213_v17 }
 0x10c   : > { %4509 = vmatprep.mubr.msk.f32.mxu1 %vm448_vm2, %v5229_v19 }
 0x10e   : > { %4310 = vmatmul.mubr.msk.f32.gmra.mrb[8].mxu0 %vm448_vm2, %v5226_v18 }
 0x10f   : > { %4510 = vmatmul.mubr.msk.f32.gmra.mrb[8].mxu1 %vm448_vm2, %v5240_v20  ;;  %4312 = vmatprep.mubr.msk.f32.mxu0 %vm448_vm2, %v5229_v19 }
 0x110   : > { %4512 = vmatprep.mubr.msk.f32.mxu1 %vm448_vm2, %v5243_v21 }
 0x112   : > { %4313 = vmatmul.mubr.msk.f32.gmra.mrb[10].mxu0 %vm448_vm2, %v5240_v20 }
 0x113   : > { %4513 = vmatmul.mubr.msk.f32.gmra.mrb[10].mxu1 %vm448_vm2, %v5254_v22  ;;  %4315 = vmatprep.mubr.msk.f32.mxu0 %vm448_vm2, %v5243_v21 }
 0x114   : > { %4515 = vmatprep.mubr.msk.f32.mxu1 %vm448_vm2, %v5257_v23 }
 0x116   : > { %4316 = vmatmul.mubr.msk.f32.gmra.mrb[12].mxu0 %vm448_vm2, %v5254_v22 }
 0x117   : > { %4516 = vmatmul.mubr.msk.f32.gmra.mrb[12].mxu1 %vm448_vm2, %v5268_v24  ;;  %4318 = vmatprep.mubr.msk.f32.mxu0 %vm448_vm2, %v5257_v23 }
 0x118   : > { %4518 = vmatprep.mubr.msk.f32.mxu1 %vm448_vm2, %v5271_v25 }
 0x11a   : > { %4319 = vmatmul.mubr.msk.f32.gmra.mrb[14].mxu0 %vm448_vm2, %v5268_v24 }
 0x11b   : > { %4519 = vmatmul.mubr.msk.f32.gmra.mrb[14].mxu1 %vm448_vm2, %v5282_v26  ;;  %4321 = vmatprep.mubr.msk.f32.mxu0 %vm448_vm2, %v5271_v25 }
 0x11c   : > { %4521 = vmatprep.mubr.msk.f32.mxu1 %vm448_vm2, %v5285_v27 }
 0x11e   : > { %4322 = vmatmul.mubr.msk.f32.gmra.mrb[16].mxu0 %vm448_vm2, %v5282_v26 }
 0x11f   : > { %4522 = vmatmul.mubr.msk.f32.gmra.mrb[16].mxu1 %vm448_vm2, %v5296_v28  ;;  %4324 = vmatprep.mubr.msk.f32.mxu0 %vm448_vm2, %v5285_v27 }
 0x120   : > { %4524 = vmatprep.mubr.msk.f32.mxu1 %vm448_vm2, %v5299_v29 }
 0x122   : > { %4325 = vmatmul.mubr.msk.f32.gmra.mrb[18].mxu0 %vm448_vm2, %v5296_v28 }
 0x123   : > { %4525 = vmatmul.mubr.msk.f32.gmra.mrb[18].mxu1 %vm448_vm2, %v5310_v30  ;;  %4327 = vmatprep.mubr.msk.f32.mxu0 %vm448_vm2, %v5299_v29 }
 0x124   : > { %4527 = vmatprep.mubr.msk.f32.mxu1 %vm448_vm2, %v5313_v31 }
 0x126   : > { %4328 = vmatmul.mubr.msk.f32.gmra.mrb[20].mxu0 %vm448_vm2, %v5310_v30 }
 0x127   : > { %4528 = vmatmul.mubr.msk.f32.gmra.mrb[20].mxu1 %vm448_vm2, %v5324_v32  ;;  %4330 = vmatprep.mubr.msk.f32.mxu0 %vm448_vm2, %v5313_v31 }
 0x128   : > { %4530 = vmatprep.mubr.msk.f32.mxu1 %vm448_vm2, %v5327_v33 }
 0x12a   : > { %4331 = vmatmul.mubr.msk.f32.gmra.mrb[22].mxu0 %vm448_vm2, %v5324_v32 }
 0x12b   : > { %4531 = vmatmul.mubr.msk.f32.gmra.mrb[22].mxu1 %vm448_vm2, %v5338_v34  ;;  %4333 = vmatprep.mubr.msk.f32.mxu0 %vm448_vm2, %v5327_v33 }
 0x12c   : > { %4533 = vmatprep.mubr.msk.f32.mxu1 %vm448_vm2, %v5341_v35 }
 0x12e   : > { %4334 = vmatmul.mubr.msk.f32.gmra.mrb[24].mxu0 %vm448_vm2, %v5338_v34 }
 0x12f   : > { %4534 = vmatmul.mubr.msk.f32.gmra.mrb[24].mxu1 %vm448_vm2, %v5352_v36  ;;  %4336 = vmatprep.mubr.msk.f32.mxu0 %vm448_vm2, %v5341_v35 }
 0x130   : > { %4536 = vmatprep.mubr.msk.f32.mxu1 %vm448_vm2, %v5355_v37 }
 0x132   : > { %4337 = vmatmul.mubr.msk.f32.gmra.mrb[26].mxu0 %vm448_vm2, %v5352_v36 }
 0x133   : > { %4537 = vmatmul.mubr.msk.f32.gmra.mrb[26].mxu1 %vm448_vm2, %v5366_v38  ;;  %4339 = vmatprep.mubr.msk.f32.mxu0 %vm448_vm2, %v5355_v37 }
 0x134   : > { %4539 = vmatprep.mubr.msk.f32.mxu1 %vm448_vm2, %v6550_v4 }
 0x136   : > { %4340 = vmatmul.mubr.msk.f32.gmra.mrb[28].mxu0 %vm448_vm2, %v5366_v38 }
 0x137   : > { %4540 = vmatmul.mubr.msk.f32.gmra.mrb[28].mxu1 %vm448_vm2, %v6551_v9  ;;  %4342 = vmatprep.mubr.msk.f32.mxu0 %vm448_vm2, %v6550_v4 }
 0x138   : > { %4542 = vmatprep.mubr.msk.f32.mxu1 %vm448_vm2, %v443_v7 }
 0x13a   : > { %4343 = vmatmul.mubr.msk.f32.gmra.mrb[30].mxu0 %vm448_vm2, %v6551_v9 }
 0x13b   : > { %4543 = vmatmul.mubr.msk.f32.gmra.mrb[30].mxu1 %vm448_vm2, %v444_v10 }
 0x1d1   : > { %v4299_v11 = vpop.f32.mrb[0].mxu0 }
 0x1d2   : > { %1636 = vst.msk [vmem:[%s5128_s7 + $0x8] sm:$0xff] %vm1634_vm3, %v4299_v11  ;;  %v2698_v12 = vsel %vm1634_vm3, %v4299_v11, 0.0  ;;  %v2841_v13 = vmul.f32 %v4299_v11, %v4299_v11  ;;  %v4499_v15 = vpop.f32.mrb[0].mxu1  ;;  %v1443_v17 = vpop.f32.mrb[1].mxu0 }
 0x1d3   : > { %3840 = vst.msk [vmem:[%s5128_s7 + $0x108] sm:$0xff] %vm1634_vm3, %v4499_v15  ;;  %v2767_v18 = vsel %vm1634_vm3, %v4499_v15, 0.0  ;;  %v2942_v19 = vmul.f32 %v4499_v15, %v4499_v15  ;;  %1635 = vst.msk [vmem:[%s5128_s7] sm:$0xff] %vm1634_vm3, %v1443_v17  ;;  %v2697_v20 = vsel %vm1634_vm3, %v1443_v17, 0.0  ;;  %v2840_v21 = vmul.f32 %v1443_v17, %v1443_v17  ;;  %v2472_v22 = vpop.f32.mrb[1].mxu1 }
 0x1d4   : > { %v2873_v23 = vsel %vm1634_vm3, %v2841_v13, 0.0  ;;  %v2699_v24 = vadd.f32 %v2698_v12, %v2697_v20  ;;  %3839 = vst.msk [vmem:[%s5128_s7 + $0x100] sm:$0xff] %vm1634_vm3, %v2472_v22  ;;  %v2766_v25 = vsel %vm1634_vm3, %v2472_v22, 0.0  ;;  %v2941_v26 = vmul.f32 %v2472_v22, %v2472_v22 }
 0x1d5   : > { %v2974_v27 = vsel %vm1634_vm3, %v2942_v19, 0.0  ;;  %v2872_v28 = vsel %vm1634_vm3, %v2840_v21, 0.0  ;;  %v2768_v29 = vadd.f32 %v2767_v18, %v2766_v25  ;;  %v4302_v30 = vpop.f32.mrb[2].mxu0 }
 0x1d6   : > { %v2874_v31 = vadd.f32 %v2873_v23, %v2872_v28  ;;  %v2973_v32 = vsel %vm1634_vm3, %v2941_v26, 0.0  ;;  %1638 = vst.msk [vmem:[%s5128_s7 + $0x18] sm:$0xff] %vm1634_vm3, %v4302_v30  ;;  %v2843_v33 = vmul.f32 %v4302_v30, %v4302_v30  ;;  %v4502_v34 = vpop.f32.mrb[2].mxu1  ;;  %v1453_v35 = vpop.f32.mrb[3].mxu0  ;;  %v2702_v47 = vsel %vm1634_vm3, %v4302_v30, 0.0 }
 0x1d7   : > { %v2975_v36 = vadd.f32 %v2974_v27, %v2973_v32  ;;  %3842 = vst.msk [vmem:[%s5128_s7 + $0x118] sm:$0xff] %vm1634_vm3, %v4502_v34  ;;  %v2944_v37 = vmul.f32 %v4502_v34, %v4502_v34  ;;  %1637 = vst.msk [vmem:[%s5128_s7 + $0x10] sm:$0xff] %vm1634_vm3, %v1453_v35  ;;  %v2700_v38 = vsel %vm1634_vm3, %v1453_v35, 0.0  ;;  %v2482_v39 = vpop.f32.mrb[3].mxu1  ;;  %v2842_v45 = vmul.f32 %v1453_v35, %v1453_v35 }
 0x1d8   : > { %v2701_v40 = vadd.f32 %v2700_v38, %v2699_v24  ;;  %3841 = vst.msk [vmem:[%s5128_s7 + $0x110] sm:$0xff] %vm1634_vm3, %v2482_v39  ;;  %v2769_v46 = vsel %vm1634_vm3, %v2482_v39, 0.0  ;;  %v2943_v49 = vmul.f32 %v2482_v39, %v2482_v39  ;;  %v2877_v51 = vsel %vm1634_vm3, %v2843_v33, 0.0 }
 0x1d9   : > { %v2770_v48 = vadd.f32 %v2769_v46, %v2768_v29  ;;  %v4305_v50 = vpop.f32.mrb[4].mxu0  ;;  %v2771_v52 = vsel %vm1634_vm3, %v4502_v34, 0.0  ;;  %v2875_v53 = vsel %vm1634_vm3, %v2842_v45, 0.0  ;;  %v2978_v57 = vsel %vm1634_vm3, %v2944_v37, 0.0 }
 0x1da   : > { %1640 = vst.msk [vmem:[%s5128_s7 + $0x28] sm:$0xff] %vm1634_vm3, %v4305_v50  ;;  %v4505_v54 = vpop.f32.mrb[4].mxu1  ;;  %v1463_v55 = vpop.f32.mrb[5].mxu0  ;;  %v2703_v56 = vadd.f32 %v2702_v47, %v2701_v40  ;;  %v2876_v58 = vadd.f32 %v2875_v53, %v2874_v31  ;;  %v2976_v59 = vsel %vm1634_vm3, %v2943_v49, 0.0  ;;  %v2845_v60 = vmul.f32 %v4305_v50, %v4305_v50 }
 0x1db   : > { %3844 = vst.msk [vmem:[%s5128_s7 + $0x128] sm:$0xff] %vm1634_vm3, %v4505_v54  ;;  %1639 = vst.msk [vmem:[%s5128_s7 + $0x20] sm:$0xff] %vm1634_vm3, %v1463_v55  ;;  %v2492_v61 = vpop.f32.mrb[5].mxu1  ;;  %v2977_v62 = vadd.f32 %v2976_v59, %v2975_v36  ;;  %v2946_v63 = vmul.f32 %v4505_v54, %v4505_v54  ;;  %v2704_v0 = vsel %vm1634_vm3, %v1463_v55, 0.0  ;;  %v2844_v1 = vmul.f32 %v1463_v55, %v1463_v55 }
 0x1dc   : > { %3843 = vst.msk [vmem:[%s5128_s7 + $0x120] sm:$0xff] %vm1634_vm3, %v2492_v61  ;;  %v2706_v2 = vsel %vm1634_vm3, %v4305_v50, 0.0  ;;  %v2705_v3 = vadd.f32 %v2704_v0, %v2703_v56  ;;  %v2878_v5 = vadd.f32 %v2877_v51, %v2876_v58  ;;  %v2772_v6 = vadd.f32 %v2771_v52, %v2770_v48 }
 0x1dd   : > { %v4308_v8 = vpop.f32.mrb[6].mxu0  ;;  %v2879_v14 = vsel %vm1634_vm3, %v2844_v1, 0.0  ;;  %v2773_v16 = vsel %vm1634_vm3, %v2492_v61, 0.0  ;;  %v2945_v41 = vmul.f32 %v2492_v61, %v2492_v61  ;;  %v2979_v43 = vadd.f32 %v2978_v57, %v2977_v62 }
 0x1de   : > { %1642 = vst.msk [vmem:[%s5128_s7 + $0x38] sm:$0xff] %vm1634_vm3, %v4308_v8  ;;  %v4508_v42 = vpop.f32.mrb[6].mxu1  ;;  %v1473_v44 = vpop.f32.mrb[7].mxu0  ;;  %v2881_v4 = vsel %vm1634_vm3, %v2845_v60, 0.0  ;;  %v2775_v7 = vsel %vm1634_vm3, %v4505_v54, 0.0  ;;  %v2880_v9 = vadd.f32 %v2879_v14, %v2878_v5  ;;  %v2774_v10 = vadd.f32 %v2773_v16, %v2772_v6 }
 0x1df   : > { %3846 = vst.msk [vmem:[%s5128_s7 + $0x138] sm:$0xff] %vm1634_vm3, %v4508_v42  ;;  %1641 = vst.msk [vmem:[%s5128_s7 + $0x30] sm:$0xff] %vm1634_vm3, %v1473_v44  ;;  %v2502_v11 = vpop.f32.mrb[7].mxu1  ;;  %v2982_v12 = vsel %vm1634_vm3, %v2946_v63, 0.0  ;;  %v2980_v13 = vsel %vm1634_vm3, %v2945_v41, 0.0  ;;  %v2847_v15 = vmul.f32 %v4308_v8, %v4308_v8  ;;  %v2707_v17 = vadd.f32 %v2706_v2, %v2705_v3 }
 0x1e0   : > { %3845 = vst.msk [vmem:[%s5128_s7 + $0x130] sm:$0xff] %vm1634_vm3, %v2502_v11  ;;  %v2981_v18 = vadd.f32 %v2980_v13, %v2979_v43  ;;  %v2948_v19 = vmul.f32 %v4508_v42, %v4508_v42  ;;  %v2708_v20 = vsel %vm1634_vm3, %v1473_v44, 0.0  ;;  %v2846_v21 = vmul.f32 %v1473_v44, %v1473_v44 }
 0x1e1   : > { %v4311_v22 = vpop.f32.mrb[8].mxu0  ;;  %v2710_v23 = vsel %vm1634_vm3, %v4308_v8, 0.0  ;;  %v2709_v24 = vadd.f32 %v2708_v20, %v2707_v17  ;;  %v2882_v25 = vadd.f32 %v2881_v4, %v2880_v9  ;;  %v2776_v26 = vadd.f32 %v2775_v7, %v2774_v10 }
 0x1e2   : > { %1644 = vst.msk [vmem:[%s5128_s7 + $0x48] sm:$0xff] %vm1634_vm3, %v4311_v22  ;;  %v4511_v27 = vpop.f32.mrb[8].mxu1  ;;  %v1483_v28 = vpop.f32.mrb[9].mxu0  ;;  %v2883_v29 = vsel %vm1634_vm3, %v2846_v21, 0.0  ;;  %v2777_v30 = vsel %vm1634_vm3, %v2502_v11, 0.0  ;;  %v2947_v31 = vmul.f32 %v2502_v11, %v2502_v11  ;;  %v2983_v32 = vadd.f32 %v2982_v12, %v2981_v18 }
 0x1e3   : > { %3848 = vst.msk [vmem:[%s5128_s7 + $0x148] sm:$0xff] %vm1634_vm3, %v4511_v27  ;;  %1643 = vst.msk [vmem:[%s5128_s7 + $0x40] sm:$0xff] %vm1634_vm3, %v1483_v28  ;;  %v2512_v33 = vpop.f32.mrb[9].mxu1  ;;  %v2885_v34 = vsel %vm1634_vm3, %v2847_v15, 0.0  ;;  %v2779_v35 = vsel %vm1634_vm3, %v4508_v42, 0.0  ;;  %v2884_v36 = vadd.f32 %v2883_v29, %v2882_v25  ;;  %v2778_v37 = vadd.f32 %v2777_v30, %v2776_v26 }
 0x1e4   : > { %3847 = vst.msk [vmem:[%s5128_s7 + $0x140] sm:$0xff] %vm1634_vm3, %v2512_v33  ;;  %v2986_v38 = vsel %vm1634_vm3, %v2948_v19, 0.0  ;;  %v2984_v39 = vsel %vm1634_vm3, %v2947_v31, 0.0  ;;  %v2849_v40 = vmul.f32 %v4311_v22, %v4311_v22  ;;  %v2711_v45 = vadd.f32 %v2710_v23, %v2709_v24 }
 0x1e5   : > { %v4314_v46 = vpop.f32.mrb[10].mxu0  ;;  %v2985_v47 = vadd.f32 %v2984_v39, %v2983_v32  ;;  %v2950_v48 = vmul.f32 %v4511_v27, %v4511_v27  ;;  %v2712_v49 = vsel %vm1634_vm3, %v1483_v28, 0.0  ;;  %v2848_v50 = vmul.f32 %v1483_v28, %v1483_v28 }
 0x1e6   : > { %1646 = vst.msk [vmem:[%s5128_s7 + $0x58] sm:$0xff] %vm1634_vm3, %v4314_v46  ;;  %v4514_v51 = vpop.f32.mrb[10].mxu1  ;;  %v1493_v52 = vpop.f32.mrb[11].mxu0  ;;  %v2714_v53 = vsel %vm1634_vm3, %v4311_v22, 0.0  ;;  %v2713_v54 = vadd.f32 %v2712_v49, %v2711_v45  ;;  %v2886_v55 = vadd.f32 %v2885_v34, %v2884_v36  ;;  %v2780_v56 = vadd.f32 %v2779_v35, %v2778_v37 }
 0x1e7   : > { %3850 = vst.msk [vmem:[%s5128_s7 + $0x158] sm:$0xff] %vm1634_vm3, %v4514_v51  ;;  %1645 = vst.msk [vmem:[%s5128_s7 + $0x50] sm:$0xff] %vm1634_vm3, %v1493_v52  ;;  %v2522_v57 = vpop.f32.mrb[11].mxu1  ;;  %v2887_v58 = vsel %vm1634_vm3, %v2848_v50, 0.0  ;;  %v2781_v59 = vsel %vm1634_vm3, %v2512_v33, 0.0  ;;  %v2949_v60 = vmul.f32 %v2512_v33, %v2512_v33  ;;  %v2987_v61 = vadd.f32 %v2986_v38, %v2985_v47 }
 0x1e8   : > { %3849 = vst.msk [vmem:[%s5128_s7 + $0x150] sm:$0xff] %vm1634_vm3, %v2522_v57  ;;  %v2889_v62 = vsel %vm1634_vm3, %v2849_v40, 0.0  ;;  %v2783_v63 = vsel %vm1634_vm3, %v4511_v27, 0.0  ;;  %v2888_v0 = vadd.f32 %v2887_v58, %v2886_v55  ;;  %v2782_v1 = vadd.f32 %v2781_v59, %v2780_v56 }
 0x1e9   : > { %v4317_v2 = vpop.f32.mrb[12].mxu0  ;;  %v2990_v3 = vsel %vm1634_vm3, %v2950_v48, 0.0  ;;  %v2988_v5 = vsel %vm1634_vm3, %v2949_v60, 0.0  ;;  %v2851_v6 = vmul.f32 %v4314_v46, %v4314_v46  ;;  %v2715_v8 = vadd.f32 %v2714_v53, %v2713_v54 }
 0x1ea   : > { %1648 = vst.msk [vmem:[%s5128_s7 + $0x68] sm:$0xff] %vm1634_vm3, %v4317_v2  ;;  %v4517_v14 = vpop.f32.mrb[12].mxu1  ;;  %v1503_v16 = vpop.f32.mrb[13].mxu0  ;;  %v2989_v41 = vadd.f32 %v2988_v5, %v2987_v61  ;;  %v2952_v43 = vmul.f32 %v4514_v51, %v4514_v51  ;;  %v2716_v42 = vsel %vm1634_vm3, %v1493_v52, 0.0  ;;  %v2850_v44 = vmul.f32 %v1493_v52, %v1493_v52 }
 0x1eb   : > { %3852 = vst.msk [vmem:[%s5128_s7 + $0x168] sm:$0xff] %vm1634_vm3, %v4517_v14  ;;  %1647 = vst.msk [vmem:[%s5128_s7 + $0x60] sm:$0xff] %vm1634_vm3, %v1503_v16  ;;  %v2532_v4 = vpop.f32.mrb[13].mxu1  ;;  %v2718_v7 = vsel %vm1634_vm3, %v4314_v46, 0.0  ;;  %v2717_v9 = vadd.f32 %v2716_v42, %v2715_v8  ;;  %v2890_v10 = vadd.f32 %v2889_v62, %v2888_v0  ;;  %v2784_v11 = vadd.f32 %v2783_v63, %v2782_v1 }
 0x1ec   : > { %3851 = vst.msk [vmem:[%s5128_s7 + $0x160] sm:$0xff] %vm1634_vm3, %v2532_v4  ;;  %v2891_v12 = vsel %vm1634_vm3, %v2850_v44, 0.0  ;;  %v2785_v13 = vsel %vm1634_vm3, %v2522_v57, 0.0  ;;  %v2951_v15 = vmul.f32 %v2522_v57, %v2522_v57  ;;  %v2991_v17 = vadd.f32 %v2990_v3, %v2989_v41 }
 0x1ed   : > { %v4320_v18 = vpop.f32.mrb[14].mxu0  ;;  %v2893_v19 = vsel %vm1634_vm3, %v2851_v6, 0.0  ;;  %v2787_v20 = vsel %vm1634_vm3, %v4514_v51, 0.0  ;;  %v2892_v21 = vadd.f32 %v2891_v12, %v2890_v10  ;;  %v2786_v22 = vadd.f32 %v2785_v13, %v2784_v11 }
 0x1ee   : > { %1650 = vst.msk [vmem:[%s5128_s7 + $0x78] sm:$0xff] %vm1634_vm3, %v4320_v18  ;;  %v4520_v23 = vpop.f32.mrb[14].mxu1  ;;  %v1513_v24 = vpop.f32.mrb[15].mxu0  ;;  %v2994_v25 = vsel %vm1634_vm3, %v2952_v43, 0.0  ;;  %v2992_v26 = vsel %vm1634_vm3, %v2951_v15, 0.0  ;;  %v2853_v27 = vmul.f32 %v4317_v2, %v4317_v2  ;;  %v2719_v28 = vadd.f32 %v2718_v7, %v2717_v9 }
 0x1ef   : > { %3854 = vst.msk [vmem:[%s5128_s7 + $0x178] sm:$0xff] %vm1634_vm3, %v4520_v23  ;;  %1649 = vst.msk [vmem:[%s5128_s7 + $0x70] sm:$0xff] %vm1634_vm3, %v1513_v24  ;;  %v2542_v29 = vpop.f32.mrb[15].mxu1  ;;  %v2993_v30 = vadd.f32 %v2992_v26, %v2991_v17  ;;  %v2954_v31 = vmul.f32 %v4517_v14, %v4517_v14  ;;  %v2720_v32 = vsel %vm1634_vm3, %v1503_v16, 0.0  ;;  %v2852_v33 = vmul.f32 %v1503_v16, %v1503_v16 }
 0x1f0   : > { %3853 = vst.msk [vmem:[%s5128_s7 + $0x170] sm:$0xff] %vm1634_vm3, %v2542_v29  ;;  %v2722_v34 = vsel %vm1634_vm3, %v4317_v2, 0.0  ;;  %v2721_v35 = vadd.f32 %v2720_v32, %v2719_v28  ;;  %v2894_v36 = vadd.f32 %v2893_v19, %v2892_v21  ;;  %v2788_v37 = vadd.f32 %v2787_v20, %v2786_v22 }
 0x1f1   : > { %v4323_v38 = vpop.f32.mrb[16].mxu0  ;;  %v2895_v39 = vsel %vm1634_vm3, %v2852_v33, 0.0  ;;  %v2789_v40 = vsel %vm1634_vm3, %v2532_v4, 0.0  ;;  %v2953_v45 = vmul.f32 %v2532_v4, %v2532_v4  ;;  %v2995_v46 = vadd.f32 %v2994_v25, %v2993_v30 }
 0x1f2   : > { %1652 = vst.msk [vmem:[%s5128_s7 + $0x88] sm:$0xff] %vm1634_vm3, %v4323_v38  ;;  %v6002_v47 = vpop.f32.mrb[16].mxu1  ;;  %v1523_v48 = vpop.f32.mrb[17].mxu0  ;;  %v2897_v49 = vsel %vm1634_vm3, %v2853_v27, 0.0  ;;  %v2791_v50 = vsel %vm1634_vm3, %v4517_v14, 0.0  ;;  %v2896_v51 = vadd.f32 %v2895_v39, %v2894_v36  ;;  %v2790_v52 = vadd.f32 %v2789_v40, %v2788_v37 }
 0x1f3   : > { %3856 = vst.msk [vmem:[%s5128_s7 + $0x188] sm:$0xff] %vm1634_vm3, %v6002_v47  ;;  %1651 = vst.msk [vmem:[%s5128_s7 + $0x80] sm:$0xff] %vm1634_vm3, %v1523_v48  ;;  %v2552_v53 = vpop.f32.mrb[17].mxu1  ;;  %v2998_v54 = vsel %vm1634_vm3, %v2954_v31, 0.0  ;;  %v2996_v55 = vsel %vm1634_vm3, %v2953_v45, 0.0  ;;  %v2855_v56 = vmul.f32 %v4320_v18, %v4320_v18  ;;  %v2723_v57 = vadd.f32 %v2722_v34, %v2721_v35 }
 0x1f4   : > { %3855 = vst.msk [vmem:[%s5128_s7 + $0x180] sm:$0xff] %vm1634_vm3, %v2552_v53  ;;  %v2997_v58 = vadd.f32 %v2996_v55, %v2995_v46  ;;  %v2956_v59 = vmul.f32 %v4520_v23, %v4520_v23  ;;  %v2724_v60 = vsel %vm1634_vm3, %v1513_v24, 0.0  ;;  %v2854_v61 = vmul.f32 %v1513_v24, %v1513_v24 }
 0x1f5   : > { %v6016_v62 = vpop.f32.mrb[18].mxu0  ;;  %v2726_v63 = vsel %vm1634_vm3, %v4320_v18, 0.0  ;;  %v2725_v0 = vadd.f32 %v2724_v60, %v2723_v57  ;;  %v2898_v1 = vadd.f32 %v2897_v49, %v2896_v51  ;;  %v2792_v2 = vadd.f32 %v2791_v50, %v2790_v52 }
 0x1f6   : > { %1654 = vst.msk [vmem:[%s5128_s7 + $0x98] sm:$0xff] %vm1634_vm3, %v6016_v62  ;;  %v6022_v3 = vpop.f32.mrb[18].mxu1  ;;  %v1533_v5 = vpop.f32.mrb[19].mxu0  ;;  %v2899_v6 = vsel %vm1634_vm3, %v2854_v61, 0.0  ;;  %v2793_v8 = vsel %vm1634_vm3, %v2542_v29, 0.0  ;;  %v2955_v14 = vmul.f32 %v2542_v29, %v2542_v29  ;;  %v2999_v16 = vadd.f32 %v2998_v54, %v2997_v58 }
 0x1f7   : > { %3858 = vst.msk [vmem:[%s5128_s7 + $0x198] sm:$0xff] %vm1634_vm3, %v6022_v3  ;;  %1653 = vst.msk [vmem:[%s5128_s7 + $0x90] sm:$0xff] %vm1634_vm3, %v1533_v5  ;;  %v2562_v41 = vpop.f32.mrb[19].mxu1  ;;  %v2901_v43 = vsel %vm1634_vm3, %v2855_v56, 0.0  ;;  %v2795_v42 = vsel %vm1634_vm3, %v4520_v23, 0.0  ;;  %v2900_v44 = vadd.f32 %v2899_v6, %v2898_v1  ;;  %v2794_v4 = vadd.f32 %v2793_v8, %v2792_v2 }
 0x1f8   : > { %3857 = vst.msk [vmem:[%s5128_s7 + $0x190] sm:$0xff] %vm1634_vm3, %v2562_v41  ;;  %v3002_v7 = vsel %vm1634_vm3, %v2956_v59, 0.0  ;;  %v3000_v9 = vsel %vm1634_vm3, %v2955_v14, 0.0  ;;  %v2857_v10 = vmul.f32 %v4323_v38, %v4323_v38  ;;  %v2727_v11 = vadd.f32 %v2726_v63, %v2725_v0 }
 0x1f9   : > { %v6037_v12 = vpop.f32.mrb[20].mxu0  ;;  %v3001_v13 = vadd.f32 %v3000_v9, %v2999_v16  ;;  %v2958_v15 = vmul.f32 %v6002_v47, %v6002_v47  ;;  %v2728_v17 = vsel %vm1634_vm3, %v1523_v48, 0.0  ;;  %v2856_v18 = vmul.f32 %v1523_v48, %v1523_v48 }
 0x1fa   : > { %1656 = vst.msk [vmem:[%s5128_s7 + $0xa8] sm:$0xff] %vm1634_vm3, %v6037_v12  ;;  %v6045_v19 = vpop.f32.mrb[20].mxu1  ;;  %v1543_v20 = vpop.f32.mrb[21].mxu0  ;;  %v2730_v21 = vsel %vm1634_vm3, %v4323_v38, 0.0  ;;  %v2729_v22 = vadd.f32 %v2728_v17, %v2727_v11  ;;  %v2902_v23 = vadd.f32 %v2901_v43, %v2900_v44  ;;  %v2796_v24 = vadd.f32 %v2795_v42, %v2794_v4 }
 0x1fb   : > { %3860 = vst.msk [vmem:[%s5128_s7 + $0x1a8] sm:$0xff] %vm1634_vm3, %v6045_v19  ;;  %1655 = vst.msk [vmem:[%s5128_s7 + $0xa0] sm:$0xff] %vm1634_vm3, %v1543_v20  ;;  %v2572_v25 = vpop.f32.mrb[21].mxu1  ;;  %v2903_v26 = vsel %vm1634_vm3, %v2856_v18, 0.0  ;;  %v2797_v27 = vsel %vm1634_vm3, %v2552_v53, 0.0  ;;  %v2957_v28 = vmul.f32 %v2552_v53, %v2552_v53  ;;  %v3003_v29 = vadd.f32 %v3002_v7, %v3001_v13 }
 0x1fc   : > { %3859 = vst.msk [vmem:[%s5128_s7 + $0x1a0] sm:$0xff] %vm1634_vm3, %v2572_v25  ;;  %v2905_v30 = vsel %vm1634_vm3, %v2857_v10, 0.0  ;;  %v2799_v31 = vsel %vm1634_vm3, %v6002_v47, 0.0  ;;  %v2904_v32 = vadd.f32 %v2903_v26, %v2902_v23  ;;  %v2798_v33 = vadd.f32 %v2797_v27, %v2796_v24 }
 0x1fd   : > { %v6060_v34 = vpop.f32.mrb[22].mxu0  ;;  %v3006_v35 = vsel %vm1634_vm3, %v2958_v15, 0.0  ;;  %v3004_v36 = vsel %vm1634_vm3, %v2957_v28, 0.0  ;;  %v2859_v37 = vmul.f32 %v6016_v62, %v6016_v62  ;;  %v2731_v38 = vadd.f32 %v2730_v21, %v2729_v22 }
 0x1fe   : > { %1658 = vst.msk [vmem:[%s5128_s7 + $0xb8] sm:$0xff] %vm1634_vm3, %v6060_v34  ;;  %v6069_v39 = vpop.f32.mrb[22].mxu1  ;;  %v6071_v40 = vpop.f32.mrb[23].mxu0  ;;  %v3005_v45 = vadd.f32 %v3004_v36, %v3003_v29  ;;  %v2960_v46 = vmul.f32 %v6022_v3, %v6022_v3  ;;  %v2732_v47 = vsel %vm1634_vm3, %v1533_v5, 0.0  ;;  %v2858_v48 = vmul.f32 %v1533_v5, %v1533_v5 }
 0x1ff   : > { %3862 = vst.msk [vmem:[%s5128_s7 + $0x1b8] sm:$0xff] %vm1634_vm3, %v6069_v39  ;;  %1657 = vst.msk [vmem:[%s5128_s7 + $0xb0] sm:$0xff] %vm1634_vm3, %v6071_v40  ;;  %v6082_v49 = vpop.f32.mrb[23].mxu1  ;;  %v2734_v50 = vsel %vm1634_vm3, %v6016_v62, 0.0  ;;  %v2733_v51 = vadd.f32 %v2732_v47, %v2731_v38  ;;  %v2906_v52 = vadd.f32 %v2905_v30, %v2904_v32  ;;  %v2800_v53 = vadd.f32 %v2799_v31, %v2798_v33 }
 0x200   : > { %3861 = vst.msk [vmem:[%s5128_s7 + $0x1b0] sm:$0xff] %vm1634_vm3, %v6082_v49  ;;  %v2907_v54 = vsel %vm1634_vm3, %v2858_v48, 0.0  ;;  %v2801_v55 = vsel %vm1634_vm3, %v2562_v41, 0.0  ;;  %v2959_v56 = vmul.f32 %v2562_v41, %v2562_v41  ;;  %v3007_v57 = vadd.f32 %v3006_v35, %v3005_v45 }
 0x201   : > { %v6091_v58 = vpop.f32.mrb[24].mxu0  ;;  %v2909_v59 = vsel %vm1634_vm3, %v2859_v37, 0.0  ;;  %v2803_v60 = vsel %vm1634_vm3, %v6022_v3, 0.0  ;;  %v2908_v61 = vadd.f32 %v2907_v54, %v2906_v52  ;;  %v2802_v62 = vadd.f32 %v2801_v55, %v2800_v53 }
 0x202   : > { %1660 = vst.msk [vmem:[%s5128_s7 + $0xc8] sm:$0xff] %vm1634_vm3, %v6091_v58  ;;  %v6099_v63 = vpop.f32.mrb[24].mxu1  ;;  %v6101_v0 = vpop.f32.mrb[25].mxu0  ;;  %v3010_v1 = vsel %vm1634_vm3, %v2960_v46, 0.0  ;;  %v3008_v2 = vsel %vm1634_vm3, %v2959_v56, 0.0  ;;  %v2861_v5 = vmul.f32 %v6037_v12, %v6037_v12  ;;  %v2735_v6 = vadd.f32 %v2734_v50, %v2733_v51 }
 0x203   : > { %3864 = vst.msk [vmem:[%s5128_s7 + $0x1c8] sm:$0xff] %vm1634_vm3, %v6099_v63  ;;  %1659 = vst.msk [vmem:[%s5128_s7 + $0xc0] sm:$0xff] %vm1634_vm3, %v6101_v0  ;;  %v6113_v3 = vpop.f32.mrb[25].mxu1  ;;  %v3009_v8 = vadd.f32 %v3008_v2, %v3007_v57  ;;  %v2962_v14 = vmul.f32 %v6045_v19, %v6045_v19  ;;  %v2736_v16 = vsel %vm1634_vm3, %v1543_v20, 0.0  ;;  %v2860_v41 = vmul.f32 %v1543_v20, %v1543_v20 }
 0x204   : > { %3863 = vst.msk [vmem:[%s5128_s7 + $0x1c0] sm:$0xff] %vm1634_vm3, %v6113_v3  ;;  %v2738_v43 = vsel %vm1634_vm3, %v6037_v12, 0.0  ;;  %v2737_v42 = vadd.f32 %v2736_v16, %v2735_v6  ;;  %v2910_v44 = vadd.f32 %v2909_v59, %v2908_v61  ;;  %v2804_v4 = vadd.f32 %v2803_v60, %v2802_v62 }
 0x205   : > { %v6123_v7 = vpop.f32.mrb[26].mxu0  ;;  %v2911_v9 = vsel %vm1634_vm3, %v2860_v41, 0.0  ;;  %v2805_v10 = vsel %vm1634_vm3, %v2572_v25, 0.0  ;;  %v2961_v11 = vmul.f32 %v2572_v25, %v2572_v25  ;;  %v3011_v13 = vadd.f32 %v3010_v1, %v3009_v8 }
 0x206   : > { %1662 = vst.msk [vmem:[%s5128_s7 + $0xd8] sm:$0xff] %vm1634_vm3, %v6123_v7  ;;  %v6130_v15 = vpop.f32.mrb[26].mxu1  ;;  %v6132_v12 = vpop.f32.mrb[27].mxu0  ;;  %v2913_v17 = vsel %vm1634_vm3, %v2861_v5, 0.0  ;;  %v2807_v18 = vsel %vm1634_vm3, %v6045_v19, 0.0  ;;  %v2912_v20 = vadd.f32 %v2911_v9, %v2910_v44  ;;  %v2806_v21 = vadd.f32 %v2805_v10, %v2804_v4 }
 0x207   : > { %3866 = vst.msk [vmem:[%s5128_s7 + $0x1d8] sm:$0xff] %vm1634_vm3, %v6130_v15  ;;  %1661 = vst.msk [vmem:[%s5128_s7 + $0xd0] sm:$0xff] %vm1634_vm3, %v6132_v12  ;;  %v6143_v22 = vpop.f32.mrb[27].mxu1  ;;  %v3014_v23 = vsel %vm1634_vm3, %v2962_v14, 0.0  ;;  %v3012_v24 = vsel %vm1634_vm3, %v2961_v11, 0.0  ;;  %v2863_v25 = vmul.f32 %v6060_v34, %v6060_v34  ;;  %v2739_v26 = vadd.f32 %v2738_v43, %v2737_v42 }
 0x208   : > { %3865 = vst.msk [vmem:[%s5128_s7 + $0x1d0] sm:$0xff] %vm1634_vm3, %v6143_v22  ;;  %v3013_v19 = vadd.f32 %v3012_v24, %v3011_v13  ;;  %v2964_v27 = vmul.f32 %v6069_v39, %v6069_v39  ;;  %v2740_v28 = vsel %vm1634_vm3, %v6071_v40, 0.0  ;;  %v2862_v29 = vmul.f32 %v6071_v40, %v6071_v40 }
 0x209   : > { %v6158_v30 = vpop.f32.mrb[28].mxu0  ;;  %v2742_v31 = vsel %vm1634_vm3, %v6060_v34, 0.0  ;;  %v2741_v32 = vadd.f32 %v2740_v28, %v2739_v26  ;;  %v2914_v33 = vadd.f32 %v2913_v17, %v2912_v20  ;;  %v2808_v35 = vadd.f32 %v2807_v18, %v2806_v21 }
 0x20a   : > { %1664 = vst.msk [vmem:[%s5128_s7 + $0xe8] sm:$0xff] %vm1634_vm3, %v6158_v30  ;;  %v6165_v36 = vpop.f32.mrb[28].mxu1  ;;  %v6167_v37 = vpop.f32.mrb[29].mxu0  ;;  %v2915_v38 = vsel %vm1634_vm3, %v2862_v29, 0.0  ;;  %v2809_v40 = vsel %vm1634_vm3, %v6082_v49, 0.0  ;;  %v2963_v45 = vmul.f32 %v6082_v49, %v6082_v49  ;;  %v3015_v34 = vadd.f32 %v3014_v23, %v3013_v19 }
 0x20b   : > { %3868 = vst.msk [vmem:[%s5128_s7 + $0x1e8] sm:$0xff] %vm1634_vm3, %v6165_v36  ;;  %1663 = vst.msk [vmem:[%s5128_s7 + $0xe0] sm:$0xff] %vm1634_vm3, %v6167_v37  ;;  %v6180_v46 = vpop.f32.mrb[29].mxu1  ;;  %v2917_v47 = vsel %vm1634_vm3, %v2863_v25, 0.0  ;;  %v2811_v48 = vsel %vm1634_vm3, %v6069_v39, 0.0  ;;  %v2916_v50 = vadd.f32 %v2915_v38, %v2914_v33  ;;  %v2810_v51 = vadd.f32 %v2809_v40, %v2808_v35 }
 0x20c   : > { %3867 = vst.msk [vmem:[%s5128_s7 + $0x1e0] sm:$0xff] %vm1634_vm3, %v6180_v46  ;;  %v3018_v49 = vsel %vm1634_vm3, %v2964_v27, 0.0  ;;  %v3016_v52 = vsel %vm1634_vm3, %v2963_v45, 0.0  ;;  %v2865_v53 = vmul.f32 %v6091_v58, %v6091_v58  ;;  %v2743_v54 = vadd.f32 %v2742_v31, %v2741_v32 }
 0x20d   : > { %v6192_v55 = vpop.f32.mrb[30].mxu0  ;;  %v3017_v56 = vadd.f32 %v3016_v52, %v3015_v34  ;;  %v2966_v39 = vmul.f32 %v6099_v63, %v6099_v63  ;;  %v2744_v57 = vsel %vm1634_vm3, %v6101_v0, 0.0  ;;  %v2864_v59 = vmul.f32 %v6101_v0, %v6101_v0 }
 0x20e   : > { %1666 = vst.msk [vmem:[%s5128_s7 + $0xf8] sm:$0xff] %vm1634_vm3, %v6192_v55  ;;  %v6203_v60 = vpop.f32.mrb[30].mxu1  ;;  %v6205_v61 = vpop.f32.mrb[31].mxu0  ;;  %v2746_v62 = vsel %vm1634_vm3, %v6091_v58, 0.0  ;;  %v2745_v1 = vadd.f32 %v2744_v57, %v2743_v54  ;;  %v2918_v2 = vadd.f32 %v2917_v47, %v2916_v50  ;;  %v2812_v5 = vadd.f32 %v2811_v48, %v2810_v51 }
 0x20f   : > { %3870 = vst.msk [vmem:[%s5128_s7 + $0x1f8] sm:$0xff] %vm1634_vm3, %v6203_v60  ;;  %1665 = vst.msk [vmem:[%s5128_s7 + $0xf0] sm:$0xff] %vm1634_vm3, %v6205_v61  ;;  %v6215_v0 = vpop.f32.mrb[31].mxu1  ;;  %v2919_v6 = vsel %vm1634_vm3, %v2864_v59, 0.0  ;;  %v2813_v8 = vsel %vm1634_vm3, %v6113_v3, 0.0  ;;  %v2965_v14 = vmul.f32 %v6113_v3, %v6113_v3  ;;  %v3019_v58 = vadd.f32 %v3018_v49, %v3017_v56 }
 0x210   : > { %3869 = vst.msk [vmem:[%s5128_s7 + $0x1f0] sm:$0xff] %vm1634_vm3, %v6215_v0  ;;  %v2921_v16 = vsel %vm1634_vm3, %v2865_v53, 0.0  ;;  %v2815_v41 = vsel %vm1634_vm3, %v6099_v63, 0.0  ;;  %v2920_v43 = vadd.f32 %v2919_v6, %v2918_v2  ;;  %v2814_v42 = vadd.f32 %v2813_v8, %v2812_v5 }
 0x211   : > { %v3022_v44 = vsel %vm1634_vm3, %v2966_v39, 0.0  ;;  %v3020_v4 = vsel %vm1634_vm3, %v2965_v14, 0.0  ;;  %v2867_v9 = vmul.f32 %v6123_v7, %v6123_v7  ;;  %v2747_v10 = vadd.f32 %v2746_v62, %v2745_v1 }
 0x212   : > { %v3021_v3 = vadd.f32 %v3020_v4, %v3019_v58  ;;  %v2968_v11 = vmul.f32 %v6130_v15, %v6130_v15  ;;  %v2748_v13 = vsel %vm1634_vm3, %v6132_v12, 0.0  ;;  %v2866_v63 = vmul.f32 %v6132_v12, %v6132_v12 }
 0x213   : > { %v2750_v17 = vsel %vm1634_vm3, %v6123_v7, 0.0  ;;  %v2749_v18 = vadd.f32 %v2748_v13, %v2747_v10  ;;  %v2922_v20 = vadd.f32 %v2921_v16, %v2920_v43  ;;  %v2816_v21 = vadd.f32 %v2815_v41, %v2814_v42 }
 0x214   : > { %v2923_v23 = vsel %vm1634_vm3, %v2866_v63, 0.0  ;;  %v2817_v24 = vsel %vm1634_vm3, %v6143_v22, 0.0  ;;  %v2967_v25 = vmul.f32 %v6143_v22, %v6143_v22  ;;  %v3023_v26 = vadd.f32 %v3022_v44, %v3021_v3 }
 0x215   : > { %v2925_v19 = vsel %vm1634_vm3, %v2867_v9, 0.0  ;;  %v2819_v12 = vsel %vm1634_vm3, %v6130_v15, 0.0  ;;  %v2924_v27 = vadd.f32 %v2923_v23, %v2922_v20  ;;  %v2818_v28 = vadd.f32 %v2817_v24, %v2816_v21 }
 0x216   : > { %v3026_v7 = vsel %vm1634_vm3, %v2968_v11, 0.0  ;;  %v3024_v29 = vsel %vm1634_vm3, %v2967_v25, 0.0  ;;  %v2869_v31 = vmul.f32 %v6158_v30, %v6158_v30  ;;  %v2751_v32 = vadd.f32 %v2750_v17, %v2749_v18 }
 0x217   : > { %v3025_v33 = vadd.f32 %v3024_v29, %v3023_v26  ;;  %v2970_v22 = vmul.f32 %v6165_v36, %v6165_v36  ;;  %v2752_v35 = vsel %vm1634_vm3, %v6167_v37, 0.0  ;;  %v2868_v15 = vmul.f32 %v6167_v37, %v6167_v37 }
 0x218   : > { %v2754_v38 = vsel %vm1634_vm3, %v6158_v30, 0.0  ;;  %v2753_v40 = vadd.f32 %v2752_v35, %v2751_v32  ;;  %v2926_v45 = vadd.f32 %v2925_v19, %v2924_v27  ;;  %v2820_v34 = vadd.f32 %v2819_v12, %v2818_v28  ;;  %v2696_v35 = vld [vmem:[%s5131_s25] sm:$0x1] }
 0x219   : > { %v2927_v47 = vsel %vm1634_vm3, %v2868_v15, 0.0  ;;  %v2821_v48 = vsel %vm1634_vm3, %v6180_v46, 0.0  ;;  %v2969_v50 = vmul.f32 %v6180_v46, %v6180_v46  ;;  %v3027_v51 = vadd.f32 %v3026_v7, %v3025_v33 }
 0x21a   : > { %v2929_v49 = vsel %vm1634_vm3, %v2869_v31, 0.0  ;;  %v2823_v37 = vsel %vm1634_vm3, %v6165_v36, 0.0  ;;  %v2928_v52 = vadd.f32 %v2927_v47, %v2926_v45  ;;  %v2822_v53 = vadd.f32 %v2821_v48, %v2820_v34  ;;  %v3220_v48 = vld [vmem:[%s5128_s7] sm:$0xff] (%p5072_p3) }
 0x21b   : > { %v3030_v30 = vsel %vm1634_vm3, %v2970_v22, 0.0  ;;  %v3028_v54 = vsel %vm1634_vm3, %v2969_v50, 0.0  ;;  %v2758_v56 = vsel %vm1634_vm3, %v6192_v55, 0.0  ;;  %v2755_v39 = vadd.f32 %v2754_v38, %v2753_v40  ;;  %v2839_v40 = vld [vmem:[%s5134_s26] sm:$0x1]  ;;  %v3222_v50 = vld [vmem:[%s5128_s7 + $0x8] sm:$0xff] (%p5072_p3)  ;;  %3221 = vst [vmem:[%s6312_s16] sm:$0xff] (%p5072_p3), %v3220_v48 }
 0x21c   : > { %v3029_v57 = vadd.f32 %v3028_v54, %v3027_v51  ;;  %v2871_v46 = vmul.f32 %v6192_v55, %v6192_v55  ;;  %v2756_v59 = vsel %vm1634_vm3, %v6205_v61, 0.0  ;;  %v2870_v36 = vmul.f32 %v6205_v61, %v6205_v61  ;;  %v3224_v51 = vld [vmem:[%s5128_s7 + $0x10] sm:$0xff] (%p5072_p3)  ;;  %v3236_v54 = vld [vmem:[%s5128_s7 + $0x40] sm:$0xff] (%p5072_p3)  ;;  %3223 = vst [vmem:[%s6312_s16 + $0x8] sm:$0xff] (%p5072_p3), %v3222_v50 }
 0x21d   : > { %v2972_v62 = vmul.f32 %v6203_v60, %v6203_v60  ;;  %v2757_v1 = vadd.f32 %v2756_v59, %v2755_v39  ;;  %v2930_v2 = vadd.f32 %v2929_v49, %v2928_v52  ;;  %v2824_v5 = vadd.f32 %v2823_v37, %v2822_v53  ;;  %v3226_v49 = vld [vmem:[%s5128_s7 + $0x18] sm:$0xff] (%p5072_p3)  ;;  %v3228_v37 = vld [vmem:[%s5128_s7 + $0x20] sm:$0xff] (%p5072_p3)  ;;  %v3230_v52 = vld [vmem:[%s5128_s7 + $0x28] sm:$0xff] (%p5072_p3)  ;;  %3225 = vst [vmem:[%s6312_s16 + $0x10] sm:$0xff] (%p5072_p3), %v3224_v51 }
 0x21e   : > { %v2931_v6 = vsel %vm1634_vm3, %v2870_v36, 0.0  ;;  %v2825_v8 = vsel %vm1634_vm3, %v6215_v0, 0.0  ;;  %v2971_v55 = vmul.f32 %v6215_v0, %v6215_v0  ;;  %v3031_v14 = vadd.f32 %v3030_v30, %v3029_v57  ;;  %v3232_v53 = vld [vmem:[%s5128_s7 + $0x30] sm:$0xff] (%p5072_p3)  ;;  %v3234_v30 = vld [vmem:[%s5128_s7 + $0x38] sm:$0xff] (%p5072_p3)  ;;  %3227 = vst [vmem:[%s6312_s16 + $0x18] sm:$0xff] (%p5072_p3), %v3226_v49  ;;  %3229 = vst [vmem:[%s6312_s16 + $0x20] sm:$0xff] (%p5072_p3), %v3228_v37 }
 0x21f   : > { %v2759_v58 = vadd.f32 %v2758_v56, %v2757_v1  ;;  %v2932_v16 = vadd.f32 %v2931_v6, %v2930_v2  ;;  %v2826_v41 = vadd.f32 %v2825_v8, %v2824_v5  ;;  %v2933_v61 = vsel %vm1634_vm3, %v2871_v46, 0.0  ;;  %v3238_v56 = vld [vmem:[%s5128_s7 + $0x48] sm:$0xff] (%p5072_p3)  ;;  %v3240_v39 = vld [vmem:[%s5128_s7 + $0x50] sm:$0xff] (%p5072_p3)  ;;  %v3242_v57 = vld [vmem:[%s5128_s7 + $0x58] sm:$0xff] (%p5072_p3)  ;;  %3231 = vst [vmem:[%s6312_s16 + $0x28] sm:$0xff] (%p5072_p3), %v3230_v52 }
 0x220   : > { %v2827_v43 = vsel %vm1634_vm3, %v6203_v60, 0.0  ;;  %v3032_v42 = vsel %vm1634_vm3, %v2971_v55, 0.0  ;;  %v3034_v3 = vsel %vm1634_vm3, %v2972_v62, 0.0  ;;  %3233 = vst [vmem:[%s6312_s16 + $0x30] sm:$0xff] (%p5072_p3), %v3232_v53  ;;  %3235 = vst [vmem:[%s6312_s16 + $0x38] sm:$0xff] (%p5072_p3), %v3234_v30  ;;  %v3244_v46 = vld [vmem:[%s5128_s7 + $0x60] sm:$0xff] (%p5072_p3) }
 0x221   : > { %v2760_v44 = vrot.slane %v2759_v58, 4  ;;  %v2934_v4 = vadd.f32 %v2933_v61, %v2932_v16  ;;  %v2828_v9 = vadd.f32 %v2827_v43, %v2826_v41  ;;  %v3033_v10 = vadd.f32 %v3032_v42, %v3031_v14  ;;  %3237 = vst [vmem:[%s6312_s16 + $0x40] sm:$0xff] (%p5072_p3), %v3236_v54  ;;  %3239 = vst [vmem:[%s6312_s16 + $0x48] sm:$0xff] (%p5072_p3), %v3238_v56  ;;  %v3246_v59 = vld [vmem:[%s5128_s7 + $0x68] sm:$0xff] (%p5072_p3)  ;;  %v3248_v36 = vld [vmem:[%s5128_s7 + $0x70] sm:$0xff] (%p5072_p3) }
 0x222   : > { %3241 = vst [vmem:[%s6312_s16 + $0x50] sm:$0xff] (%p5072_p3), %v3240_v39  ;;  %3243 = vst [vmem:[%s6312_s16 + $0x58] sm:$0xff] (%p5072_p3), %v3242_v57  ;;  %v3250_v62 = vld [vmem:[%s5128_s7 + $0x78] sm:$0xff] (%p5072_p3)  ;;  %v3252_v1 = vld [vmem:[%s5128_s7 + $0x80] sm:$0xff] (%p5072_p3) }
 0x223   : > { %v2761_v11 = vadd.f32 %v2760_v44, %v2759_v58  ;;  %v2935_v13 = vrot.slane %v2934_v4, 4  ;;  %v2829_v0 = vrot.slane %v2828_v9, 4  ;;  %v3035_v63 = vadd.f32 %v3034_v3, %v3033_v10  ;;  %3245 = vst [vmem:[%s6312_s16 + $0x60] sm:$0xff] (%p5072_p3), %v3244_v46  ;;  %3247 = vst [vmem:[%s6312_s16 + $0x68] sm:$0xff] (%p5072_p3), %v3246_v59  ;;  %v3254_v2 = vld [vmem:[%s5128_s7 + $0x88] sm:$0xff] (%p5072_p3)  ;;  %v3256_v5 = vld [vmem:[%s5128_s7 + $0x90] sm:$0xff] (%p5072_p3) }
 0x224   : > { %3249 = vst [vmem:[%s6312_s16 + $0x70] sm:$0xff] (%p5072_p3), %v3248_v36  ;;  %3251 = vst [vmem:[%s6312_s16 + $0x78] sm:$0xff] (%p5072_p3), %v3250_v62  ;;  %v3258_v6 = vld [vmem:[%s5128_s7 + $0x98] sm:$0xff] (%p5072_p3)  ;;  %v3260_v8 = vld [vmem:[%s5128_s7 + $0xa0] sm:$0xff] (%p5072_p3) }
 0x225   : > { %v2762_v17 = vrot.slane %v2761_v11, 2  ;;  %v2936_v18 = vadd.f32 %v2935_v13, %v2934_v4  ;;  %v2830_v20 = vadd.f32 %v2829_v0, %v2828_v9  ;;  %v3036_v21 = vrot.slane %v3035_v63, 4  ;;  %3253 = vst [vmem:[%s6312_s16 + $0x80] sm:$0xff] (%p5072_p3), %v3252_v1  ;;  %3255 = vst [vmem:[%s6312_s16 + $0x88] sm:$0xff] (%p5072_p3), %v3254_v2  ;;  %v3262_v55 = vld [vmem:[%s5128_s7 + $0xa8] sm:$0xff] (%p5072_p3)  ;;  %v3264_v14 = vld [vmem:[%s5128_s7 + $0xb0] sm:$0xff] (%p5072_p3) }
 0x226   : > { %3257 = vst [vmem:[%s6312_s16 + $0x90] sm:$0xff] (%p5072_p3), %v3256_v5  ;;  %3259 = vst [vmem:[%s6312_s16 + $0x98] sm:$0xff] (%p5072_p3), %v3258_v6  ;;  %v3266_v58 = vld [vmem:[%s5128_s7 + $0xb8] sm:$0xff] (%p5072_p3)  ;;  %v3268_v16 = vld [vmem:[%s5128_s7 + $0xc0] sm:$0xff] (%p5072_p3) }
 0x227   : > { %v2763_v23 = vadd.f32 %v2762_v17, %v2761_v11  ;;  %v2937_v24 = vrot.slane %v2936_v18, 2  ;;  %v2831_v60 = vrot.slane %v2830_v20, 2  ;;  %v3037_v25 = vadd.f32 %v3036_v21, %v3035_v63  ;;  %3261 = vst [vmem:[%s6312_s16 + $0xa0] sm:$0xff] (%p5072_p3), %v3260_v8  ;;  %3263 = vst [vmem:[%s6312_s16 + $0xa8] sm:$0xff] (%p5072_p3), %v3262_v55  ;;  %v3270_v41 = vld [vmem:[%s5128_s7 + $0xc8] sm:$0xff] (%p5072_p3)  ;;  %v3272_v61 = vld [vmem:[%s5128_s7 + $0xd0] sm:$0xff] (%p5072_p3) }
 0x228   : > { %3265 = vst [vmem:[%s6312_s16 + $0xb0] sm:$0xff] (%p5072_p3), %v3264_v14  ;;  %3267 = vst [vmem:[%s6312_s16 + $0xb8] sm:$0xff] (%p5072_p3), %v3266_v58  ;;  %v3274_v43 = vld [vmem:[%s5128_s7 + $0xd8] sm:$0xff] (%p5072_p3)  ;;  %v3276_v42 = vld [vmem:[%s5128_s7 + $0xe0] sm:$0xff] (%p5072_p3) }
 0x229   : > { %v2764_v26 = vrot.slane %v2763_v23, 1  ;;  %v2938_v19 = vadd.f32 %v2937_v24, %v2936_v18  ;;  %v2832_v12 = vadd.f32 %v2831_v60, %v2830_v20  ;;  %v3038_v27 = vrot.slane %v3037_v25, 2  ;;  %3269 = vst [vmem:[%s6312_s16 + $0xc0] sm:$0xff] (%p5072_p3), %v3268_v16  ;;  %3271 = vst [vmem:[%s6312_s16 + $0xc8] sm:$0xff] (%p5072_p3), %v3270_v41  ;;  %v3278_v44 = vld [vmem:[%s5128_s7 + $0xe8] sm:$0xff] (%p5072_p3)  ;;  %v3280_v4 = vld [vmem:[%s5128_s7 + $0xf0] sm:$0xff] (%p5072_p3) }
 0x22a   : > { %3273 = vst [vmem:[%s6312_s16 + $0xd0] sm:$0xff] (%p5072_p3), %v3272_v61  ;;  %3275 = vst [vmem:[%s6312_s16 + $0xd8] sm:$0xff] (%p5072_p3), %v3274_v43  ;;  %v3282_v9 = vld [vmem:[%s5128_s7 + $0xf8] sm:$0xff] (%p5072_p3)  ;;  %v3284_v10 = vld [vmem:[%s5128_s7 + $0x100] sm:$0xff] (%p5072_p3) }
 0x22b   : > { %v2765_v28 = vadd.f32 %v2764_v26, %v2763_v23  ;;  %v2939_v7 = vrot.slane %v2938_v19, 1  ;;  %v2833_v29 = vrot.slane %v2832_v12, 1  ;;  %v3039_v31 = vadd.f32 %v3038_v27, %v3037_v25  ;;  %3277 = vst [vmem:[%s6312_s16 + $0xe0] sm:$0xff] (%p5072_p3), %v3276_v42  ;;  %3279 = vst [vmem:[%s6312_s16 + $0xe8] sm:$0xff] (%p5072_p3), %v3278_v44  ;;  %v3286_v3 = vld [vmem:[%s5128_s7 + $0x108] sm:$0xff] (%p5072_p3)  ;;  %v3288_v11 = vld [vmem:[%s5128_s7 + $0x110] sm:$0xff] (%p5072_p3) }
 0x22c   : > { %3281 = vst [vmem:[%s6312_s16 + $0xf0] sm:$0xff] (%p5072_p3), %v3280_v4  ;;  %3283 = vst [vmem:[%s6312_s16 + $0xf8] sm:$0xff] (%p5072_p3), %v3282_v9  ;;  %v3290_v13 = vld [vmem:[%s5128_s7 + $0x118] sm:$0xff] (%p5072_p3)  ;;  %v3292_v0 = vld [vmem:[%s5128_s7 + $0x120] sm:$0xff] (%p5072_p3) }
 0x22d   : > { %v2940_v32 = vadd.f32 %v2939_v7, %v2938_v19  ;;  %v2834_v33 = vadd.f32 %v2833_v29, %v2832_v12  ;;  %v3040_v22 = vrot.slane %v3039_v31, 1  ;;  %3285 = vst [vmem:[%s6312_s16 + $0x200] sm:$0xff] (%p5072_p3), %v3284_v10  ;;  %3287 = vst [vmem:[%s6312_s16 + $0x208] sm:$0xff] (%p5072_p3), %v3286_v3  ;;  %v3294_v63 = vld [vmem:[%s5128_s7 + $0x128] sm:$0xff] (%p5072_p3)  ;;  %v3296_v17 = vld [vmem:[%s5128_s7 + $0x130] sm:$0xff] (%p5072_p3) }
 0x22e   : > { %3289 = vst [vmem:[%s6312_s16 + $0x210] sm:$0xff] (%p5072_p3), %v3288_v11  ;;  %3291 = vst [vmem:[%s6312_s16 + $0x218] sm:$0xff] (%p5072_p3), %v3290_v13  ;;  %v3298_v18 = vld [vmem:[%s5128_s7 + $0x138] sm:$0xff] (%p5072_p3)  ;;  %v3300_v20 = vld [vmem:[%s5128_s7 + $0x140] sm:$0xff] (%p5072_p3) }
 0x22f   : > { %v2835_v15 = vadd.f32 %v2834_v33, %v2765_v28  ;;  %v3041_v38 = vadd.f32 %v3040_v22, %v3039_v31  ;;  %3059 = sbr.rel (!%p5072_p3) target bundleno = 574 (0x23e), region = 40  ;;  %3293 = vst [vmem:[%s6312_s16 + $0x220] sm:$0xff] (%p5072_p3), %v3292_v0  ;;  %3295 = vst [vmem:[%s6312_s16 + $0x228] sm:$0xff] (%p5072_p3), %v3294_v63  ;;  %v3302_v21 = vld [vmem:[%s5128_s7 + $0x148] sm:$0xff] (%p5072_p3)  ;;  %v3304_v23 = vld [vmem:[%s5128_s7 + $0x150] sm:$0xff] (%p5072_p3) }
 0x230   : > { %3297 = vst [vmem:[%s6312_s16 + $0x230] sm:$0xff] (%p5072_p3), %v3296_v17  ;;  %3299 = vst [vmem:[%s6312_s16 + $0x238] sm:$0xff] (%p5072_p3), %v3298_v18  ;;  %v3306_v24 = vld [vmem:[%s5128_s7 + $0x158] sm:$0xff] (%p5072_p3)  ;;  %v3308_v60 = vld [vmem:[%s5128_s7 + $0x160] sm:$0xff] (%p5072_p3) }
 0x231   : > { %v2836_v45 = vadd.f32 %v2835_v15, %v2696_v35  ;;  %v3042_v34 = vadd.f32 %v3041_v38, %v2940_v32  ;;  %3301 = vst [vmem:[%s6312_s16 + $0x240] sm:$0xff] (%p5072_p3), %v3300_v20  ;;  %3303 = vst [vmem:[%s6312_s16 + $0x248] sm:$0xff] (%p5072_p3), %v3302_v21  ;;  %v3310_v25 = vld [vmem:[%s5128_s7 + $0x168] sm:$0xff] (%p5072_p3)  ;;  %v3312_v26 = vld [vmem:[%s5128_s7 + $0x170] sm:$0xff] (%p5072_p3) }
 0x232   : > { %3305 = vst [vmem:[%s6312_s16 + $0x250] sm:$0xff] (%p5072_p3), %v3304_v23  ;;  %3307 = vst [vmem:[%s6312_s16 + $0x258] sm:$0xff] (%p5072_p3), %v3306_v24  ;;  %v3314_v19 = vld [vmem:[%s5128_s7 + $0x178] sm:$0xff] (%p5072_p3)  ;;  %v3316_v12 = vld [vmem:[%s5128_s7 + $0x180] sm:$0xff] (%p5072_p3) }
 0x233   : > { %2838 = vst.msk [vmem:[%s5131_s25] sm:$0x1] %vm2837_vm4, %v2836_v45  ;;  %v3043_v47 = vadd.f32 %v3042_v34, %v2839_v40  ;;  %3309 = vst [vmem:[%s6312_s16 + $0x260] sm:$0xff] (%p5072_p3), %v3308_v60  ;;  %v3318_v27 = vld [vmem:[%s5128_s7 + $0x188] sm:$0xff] (%p5072_p3)  ;;  %v3320_v28 = vld [vmem:[%s5128_s7 + $0x190] sm:$0xff] (%p5072_p3) }
 0x234   : > { %3311 = vst [vmem:[%s6312_s16 + $0x268] sm:$0xff] (%p5072_p3), %v3310_v25  ;;  %3313 = vst [vmem:[%s6312_s16 + $0x270] sm:$0xff] (%p5072_p3), %v3312_v26  ;;  %v3322_v7 = vld [vmem:[%s5128_s7 + $0x198] sm:$0xff] (%p5072_p3)  ;;  %v3324_v29 = vld [vmem:[%s5128_s7 + $0x1a0] sm:$0xff] (%p5072_p3) }
 0x235   : > { %3044 = vst.msk [vmem:[%s5134_s26] sm:$0x1] %vm2837_vm4, %v3043_v47  ;;  %3315 = vst [vmem:[%s6312_s16 + $0x278] sm:$0xff] (%p5072_p3), %v3314_v19  ;;  %v3326_v31 = vld [vmem:[%s5128_s7 + $0x1a8] sm:$0xff] (%p5072_p3)  ;;  %v3328_v32 = vld [vmem:[%s5128_s7 + $0x1b0] sm:$0xff] (%p5072_p3) }
 0x236   : > { %3317 = vst [vmem:[%s6312_s16 + $0x280] sm:$0xff] %v3316_v12  ;;  %3319 = vst [vmem:[%s6312_s16 + $0x288] sm:$0xff] %v3318_v27  ;;  %v3330_v33 = vld [vmem:[%s5128_s7 + $0x1b8] sm:$0xff]  ;;  %v3332_v22 = vld [vmem:[%s5128_s7 + $0x1c0] sm:$0xff] }
 0x237   : > { %3321 = vst [vmem:[%s6312_s16 + $0x290] sm:$0xff] %v3320_v28  ;;  %3323 = vst [vmem:[%s6312_s16 + $0x298] sm:$0xff] %v3322_v7  ;;  %v3334_v35 = vld [vmem:[%s5128_s7 + $0x1c8] sm:$0xff]  ;;  %v3336_v15 = vld [vmem:[%s5128_s7 + $0x1d0] sm:$0xff] }
 0x238   : > { %3325 = vst [vmem:[%s6312_s16 + $0x2a0] sm:$0xff] %v3324_v29  ;;  %3327 = vst [vmem:[%s6312_s16 + $0x2a8] sm:$0xff] %v3326_v31  ;;  %v3338_v38 = vld [vmem:[%s5128_s7 + $0x1d8] sm:$0xff]  ;;  %v3340_v40 = vld [vmem:[%s5128_s7 + $0x1e0] sm:$0xff] }
 0x239   : > { %3329 = vst [vmem:[%s6312_s16 + $0x2b0] sm:$0xff] %v3328_v32  ;;  %3331 = vst [vmem:[%s6312_s16 + $0x2b8] sm:$0xff] %v3330_v33  ;;  %v3342_v45 = vld [vmem:[%s5128_s7 + $0x1e8] sm:$0xff]  ;;  %v3344_v34 = vld [vmem:[%s5128_s7 + $0x1f0] sm:$0xff] }
 0x23a   : > { %3333 = vst [vmem:[%s6312_s16 + $0x2c0] sm:$0xff] %v3332_v22  ;;  %3335 = vst [vmem:[%s6312_s16 + $0x2c8] sm:$0xff] %v3334_v35  ;;  %v3346_v47 = vld [vmem:[%s5128_s7 + $0x1f8] sm:$0xff] }
 0x23b   : > { %3337 = vst [vmem:[%s6312_s16 + $0x2d0] sm:$0xff] %v3336_v15  ;;  %3339 = vst [vmem:[%s6312_s16 + $0x2d8] sm:$0xff] %v3338_v38 }
 0x23c   : > { %3341 = vst [vmem:[%s6312_s16 + $0x2e0] sm:$0xff] %v3340_v40  ;;  %3343 = vst [vmem:[%s6312_s16 + $0x2e8] sm:$0xff] %v3342_v45 }
 0x23d   : > { %3345 = vst [vmem:[%s6312_s16 + $0x2f0] sm:$0xff] %v3344_v34  ;;  %3347 = vst [vmem:[%s6312_s16 + $0x2f8] sm:$0xff] %v3346_v47 }
 0x23e PF: > { %s3875_s23 = sshll.u32 %s4963_s24, 4  ;;  %s3360_s29 = sshll.u32 %s5131_s25, 4  ;;  %s3361_s29 = int_to_ptr.vmem [resolvable:$true] %s3360_s29 }
 0x23f   : > { %s3358_s21 = scalar_lea.hbm %s6519_s4, %s3875_s23  ;;  %s4833_s17 = scalar_lea.vmem %s3361_s29, 16 }
 0x240   : > { %p4834_p3 = scmp.ne.s32.totalorder %s3361_s29, %s4833_s17  ;;  %s4978_s8 = smov [#allocation3]  }
 0x241   : > { %s4837_s10 = sshll.u32 %s4978_s8, 4  ;;  %s4838_s10 = int_to_ptr.vmem [resolvable:$false] %s4837_s10 }
 0x242   : > { %p4835_p8 = pnand %p4834_p3, %p5083_p7  ;;  %s4839_s6 = scalar_lea.vmem %s4838_s10, 32 }
 0x243   : > { %p4840_p10 = scmp.lt.s32.totalorder %s3361_s29, %s4838_s10  ;;  %p4841_p11 = scmp.lt.s32.totalorder %s4839_s6, %s4833_s17 }
 0x244   : > { %p4836_p9 = pneg %p4835_p8 }
 0x245   : > { %p4842_p13 = por %p4841_p11, %p4840_p10 }
 0x247   : > { %p4843_p0 = pnand %p4842_p13, %p4836_p9 }
 0x249   : > { %4846 = shalt.err (!%p4843_p0)
}
 0x24a   : > { %s4847_s7 = scalar_lea.hbm %s3358_s21, 16  ;;  %s4851_s22 = scalar_lea.hbm %s6519_s4, 32 }
 0x24b   : > { %p4848_p1 = scmp.ne.s32.totalorder %s3358_s21, %s4847_s7  ;;  %p4852_p5 = scmp.lt.u32.totalorder %s3358_s21, %s6519_s4 }
 0x24c   : > { %p4853_p6 = scmp.lt.u32.totalorder %s4851_s22, %s4847_s7  ;;  %p4855_p8 = scmp.lt.u32.totalorder %s4847_s7, %s3358_s21 }
 0x24d   : > { %p4849_p2 = pnand %p4848_p1, %p5083_p7 }
 0x24e   : > { %p4854_p3 = por %p4853_p6, %p4852_p5 }
 0x24f   : > { %p4850_p4 = pneg %p4849_p2 }
 0x250   : > { %p4856_p10 = por %p4855_p8, %p4854_p3 }
 0x252   : > { %p4857_p9 = pnand %p4856_p10, %p4850_p4 }
 0x254   : > { %4860 = shalt.err (!%p4857_p9)
}
 0x255   : > { %4740 = dma.vmem_to_hbm [thread:$0]  (%p5083_p7), %s3361_s29, 16, %s3358_s21, %s3050_s18  }
 0x256   : > { %s6459_s16 = scalar_lea.hbm %s6520_s5, %s3875_s23  ;;  %s3373_s12 = sshll.u32 %s5134_s26, 4  ;;  %s3374_s12 = int_to_ptr.vmem [resolvable:$true] %s3373_s12 }
 0x257   : > { %s4861_s13 = scalar_lea.vmem %s3374_s12, 16  ;;  %s4979_s17 = smov [#allocation5]  }
 0x258   : > { %p4862_p11 = scmp.ne.s32.totalorder %s3374_s12, %s4861_s13  ;;  %s4865_s8 = sshll.u32 %s4979_s17, 4  ;;  %s4866_s8 = int_to_ptr.vmem [resolvable:$false] %s4865_s8 }
 0x259   : > { %s4867_s10 = scalar_lea.vmem %s4866_s8, 32  ;;  %p4868_p1 = scmp.lt.s32.totalorder %s3374_s12, %s4866_s8 }
 0x25a   : > { %p4863_p13 = pnand %p4862_p11, %p5083_p7  ;;  %p4869_p2 = scmp.lt.s32.totalorder %s4867_s10, %s4861_s13 }
 0x25c   : > { %p4864_p0 = pneg %p4863_p13  ;;  %p4870_p4 = por %p4869_p2, %p4868_p1 }
 0x25e   : > { %p4871_p5 = pnand %p4870_p4, %p4864_p0 }
 0x260   : > { %4874 = shalt.err (!%p4871_p5)
}
 0x261   : > { %s4875_s24 = scalar_lea.hbm %s6459_s16, 16  ;;  %s4879_s23 = scalar_lea.hbm %s6520_s5, 32 }
 0x262   : > { %p4876_p6 = scmp.ne.s32.totalorder %s6459_s16, %s4875_s24  ;;  %p4880_p10 = scmp.lt.u32.totalorder %s6459_s16, %s6520_s5 }
 0x263   : > { %p4881_p9 = scmp.lt.u32.totalorder %s4879_s23, %s4875_s24  ;;  %p4883_p13 = scmp.lt.u32.totalorder %s4875_s24, %s6459_s16 }
 0x264   : > { %p4877_p3 = pnand %p4876_p6, %p5083_p7 }
 0x265   : > { %p4882_p11 = por %p4881_p9, %p4880_p10 }
 0x266   : > { %p4878_p8 = pneg %p4877_p3 }
 0x267   : > { %p4884_p0 = por %p4883_p13, %p4882_p11 }
 0x269   : > { %p4885_p1 = pnand %p4884_p0, %p4878_p8 }
 0x26b   : > { %4888 = shalt.err (!%p4885_p1)
}
 0x26c   : > { %4741 = dma.vmem_to_hbm [thread:$0]  (%p5083_p7), %s3374_s12, 16, %s6459_s16, %s3054_s19  }
 0x26d PF: > { %s6552_s6 = sld [smem:[#allocation9_spill]]  ;;  %p4751_p2 = scmp.ge.s32.totalorder %s4975_s27, 2 }
 0x26f   : > { %p4745_p4 = pnand %p4751_p2, %p5090_p12 }
 0x273   : > { %s3392_s25 = sand.u32 1, %s6552_s6  }
 0x274   : > { %s3393_s20 = scalar_lea.sflag [#allocation4], %s3392_s25 }
 0x275   : > { %4930 = dma.done.wait (!%p4745_p4), %s3393_s20, 16  }
 0x276   : > { %4932 = vsyncadd (!%p4745_p4), %s3393_s20, 4294967280  ;;  %s3401_s22 = scalar_lea.sflag [#allocation6], %s3392_s25 }
 0x277   : > { %4934 = dma.done.wait (!%p4745_p4), %s3401_s22, 16  }
 0x278   : > { %4936 = vsyncadd (!%p4745_p4), %s3401_s22, 4294967280  ;;  %s22_s27 = sadd.s32 1, %s4975_s27   ;;  %s6554_s18 = sld [smem:[#allocation10_spill]] }
 0x279   : > { %p19_p5 = scmp.ge.s32.totalorder %s22_s27, 6   ;;  %s6555_s19 = sld [smem:[#allocation11_spill]] }
 0x27a   : > { %s6556_s20 = sld [smem:[#allocation18_spill]]  ;;  %s6557_s21 = sld [smem:[#allocation12_spill]] }
 0x27b   : > { %s6558_s22 = sld [smem:[#allocation19_spill]]  ;;  %s6559_s23 = sld [smem:[#allocation13_spill]] }
 0x27c   : > { %s6560_s24 = sld [smem:[#allocation14_spill]]  ;;  %s6561_s25 = sld [smem:[#allocation15_spill]] }
 0x27d   : > { %s6562_s26 = sld [smem:[#allocation16_spill]]  ;;  %21 = sbr.rel (!%p19_p5) target bundleno = 8 (0x8), region = 152 }
 0x284   :  { %3405 = vsyncpa [#allocation4], 1 }
 0x285   :  { %3407 = vsyncpa [#allocation4 + $0x1], 1 }
 0x286   :  { %3408 = vsyncpa [#allocation6], 1 }
 0x287   :  { %3410 = vsyncpa [#allocation6 + $0x1], 1 }

</bundles_post_ra>
